<compile_context>
chip_gen: v6e
topology: v6e:2x2x1
jax: 0.10.0
libtpu: 0.0.40
codegen_flags: <defaults>
</compile_context>

<pallas_src>
import functools

import jax
import jax.numpy as jnp
from jax.experimental import pallas as pl
from jax.experimental.pallas import tpu as pltpu

INPUT = 1024
HIDDEN = 1024
CLASS_NUM = 9
# Second matmul output is padded to a lane-dense width (multiple of 128);
# the true classNum=9 columns are sliced out in the wrapper.
CLASS_PAD = 128


def mlp_kernel(x_ref, w1_ref, b1_ref, w2_ref, b2_ref, o_ref):
    # Fc1: bf16 MXU inputs, f32 accumulation. x cast done in-kernel (VPU, hidden
    # under the MXU), W1 arrives already bf16 and stays resident in VMEM.
    x = x_ref[...].astype(jnp.bfloat16)
    h = jnp.dot(x, w1_ref[...], preferred_element_type=jnp.float32)
    # Bias + ReLU in f32.
    h = jnp.maximum(h + b1_ref[...], 0.0)
    # Fc2: bf16 MXU inputs, f32 accumulation, lane-dense (128-wide) padded output.
    out = jnp.dot(h.astype(jnp.bfloat16), w2_ref[...],
                  preferred_element_type=jnp.float32)
    o_ref[...] = (out + b2_ref[...]).astype(o_ref.dtype)


def prepare_params(w1, b1, w2, b2):
    """One-time parameter prep (hoisted out of the per-call path)."""
    w1_bf = w1.astype(jnp.bfloat16)
    b1_r = b1.reshape(1, HIDDEN).astype(jnp.float32)
    w2_p = (jnp.zeros((HIDDEN, CLASS_PAD), jnp.bfloat16)
            .at[:, :CLASS_NUM].set(w2.astype(jnp.bfloat16)))
    b2_p = (jnp.zeros((1, CLASS_PAD), jnp.float32)
            .at[:, :CLASS_NUM].set(b2.astype(jnp.float32)))
    return w1_bf, b1_r, w2_p, b2_p


@functools.partial(jax.jit, static_argnames=("block_b",))
def mlp_forward(x, w1_bf, b1_r, w2_p, b2_p, *, block_b=256):
    """x: (B, INPUT) f32.  Returns (B, CLASS_NUM) f32.

    block_b: batch tile. 256 fills the v6e/v7x MXU (use 128 on v5e, or 512 on v6e
    to halve per-step overhead once W1 is resident). Capped to the sublane-rounded
    batch so small batches use a single minimal tile.
    """
    B, D = x.shape
    assert D == INPUT

    # Cap the tile at the (sublane-rounded) batch; block_b stays a multiple of 8.
    block_b_eff = min(block_b, ((B + 7) // 8) * 8)
    n_bt = pl.cdiv(B, block_b_eff)

    out_padded = pl.pallas_call(
        mlp_kernel,
        out_shape=jax.ShapeDtypeStruct((B, CLASS_PAD), jnp.float32),
        grid_spec=pltpu.PrefetchScalarGridSpec(
            num_scalar_prefetch=0,
            grid=(n_bt,),
            in_specs=[
                pl.BlockSpec((block_b_eff, INPUT), lambda i: (i, 0)),   # x tile (f32)
                pl.BlockSpec((INPUT, HIDDEN), lambda i: (0, 0)),        # W1, VMEM-resident
                pl.BlockSpec((1, HIDDEN), lambda i: (0, 0)),            # b1
                pl.BlockSpec((HIDDEN, CLASS_PAD), lambda i: (0, 0)),    # W2 (padded)
                pl.BlockSpec((1, CLASS_PAD), lambda i: (0, 0)),         # b2 (padded)
            ],
            out_specs=pl.BlockSpec((block_b_eff, CLASS_PAD), lambda i: (i, 0)),
        ),
        compiler_params=pltpu.CompilerParams(
            # Batch tiles are independent -> shard across TensorCores (v7x megacore).
            dimension_semantics=("parallel",),
            # Resident W1 (2 MiB) + W2/biases + double-buffered x/out + h temps
            # total well under this on all of v5e/v6e/v7x, even at block_b=512.
            vmem_limit_bytes=32 * 1024 * 1024,
        ),
    )(x, w1_bf, b1_r, w2_p, b2_p)

    # Padded class columns (and any masked partial-tile rows) sliced off here.
    return out_padded[:B, :CLASS_NUM]


def init_params(key):
    """Deterministic init mimicking nn.Linear default (uniform +-1/sqrt(fan_in))."""
    k1, k2, k3, k4 = jax.random.split(key, 4)
    bound1 = 1.0 / jnp.sqrt(jnp.float32(INPUT))
    bound2 = 1.0 / jnp.sqrt(jnp.float32(HIDDEN))
    w1 = jax.random.uniform(k1, (INPUT, HIDDEN), jnp.float32, -bound1, bound1)
    b1 = jax.random.uniform(k2, (HIDDEN,), jnp.float32, -bound1, bound1)
    w2 = jax.random.uniform(k3, (HIDDEN, CLASS_NUM), jnp.float32, -bound2, bound2)
    b2 = jax.random.uniform(k4, (CLASS_NUM,), jnp.float32, -bound2, bound2)
    return w1, b1, w2, b2


if __name__ == "__main__":
    key = jax.random.PRNGKey(0)
    kx, kp = jax.random.split(key)
    batch = 8
    x = jax.random.normal(kx, (batch, INPUT), jnp.float32)
    w1, b1, w2, b2 = init_params(kp)
    params = prepare_params(w1, b1, w2, b2)   # one-time prep, not per call

    out = mlp_forward(x, *params)
    out = jax.block_until_ready(out)

    # Pure-JAX f32 reference of the forward-pass semantics.  The kernel runs its
    # matmuls with bf16 inputs (f32 accumulation), so use a loose tolerance.
    ref = jnp.maximum(x @ w1 + b1, 0.0) @ w2 + b2
    assert out.shape == (batch, CLASS_NUM)
    assert jnp.allclose(out, ref, atol=5e-2, rtol=5e-2), float(
        jnp.max(jnp.abs(out - ref)))

    print("KERNEL_OK")
</pallas_src>

<mosaic_0001>
module attributes {stable_mosaic.version = 11 : i64} {
  func.func @mlp_kernel(%arg0: i32, %arg1: memref<8x1024xf32, #tpu.memory_space<vmem>>, %arg2: memref<1024x1024xbf16, #tpu.memory_space<vmem>>, %arg3: memref<1x1024xf32, #tpu.memory_space<vmem>>, %arg4: memref<1024x128xbf16, #tpu.memory_space<vmem>>, %arg5: memref<1x128xf32, #tpu.memory_space<vmem>>, %arg6: memref<8x128xf32, #tpu.memory_space<vmem>>) attributes {dimension_semantics = [#tpu.dimension_semantics<parallel>], iteration_bounds = array<i64: 1>, scalar_prefetch = 0 : i64, scratch_operands = 0 : i64, tpu.core_type = #tpu.core_type<tc>, window_params = [{transform_indices = @transform_0, window_bounds = array<i64: 8, 1024>}, {pipeline_mode = #tpu.pipeline_mode<synchronous>, transform_indices = @transform_1, window_bounds = array<i64: 1024, 1024>}, {pipeline_mode = #tpu.pipeline_mode<synchronous>, transform_indices = @transform_2, window_bounds = array<i64: 1, 1024>}, {pipeline_mode = #tpu.pipeline_mode<synchronous>, transform_indices = @transform_3, window_bounds = array<i64: 1024, 128>}, {pipeline_mode = #tpu.pipeline_mode<synchronous>, transform_indices = @transform_4, window_bounds = array<i64: 1, 128>}, {transform_indices = @transform_5, window_bounds = array<i64: 8, 128>}]} {
    %c0 = arith.constant 0 : index
    %c0_0 = arith.constant 0 : index
    %0 = vector.load %arg1[%c0, %c0_0] : memref<8x1024xf32, #tpu.memory_space<vmem>>, vector<8x1024xf32>
    %1 = arith.truncf %0 : vector<8x1024xf32> to vector<8x1024xbf16>
    %c0_1 = arith.constant 0 : index
    %c0_2 = arith.constant 0 : index
    %2 = vector.load %arg2[%c0_1, %c0_2] : memref<1024x1024xbf16, #tpu.memory_space<vmem>>, vector<1024x1024xbf16>
    %cst = arith.constant dense<0.000000e+00> : vector<8x1024xf32>
    %3 = tpu.matmul %1, %2, %cst {dimension_numbers = #tpu.dot_dimension_numbers<[1], [0], [0], [1], [0, 0, 1, 1], [], []>} : vector<8x1024xbf16>, vector<1024x1024xbf16>, vector<8x1024xf32> -> vector<8x1024xf32>
    %c0_3 = arith.constant 0 : index
    %c0_4 = arith.constant 0 : index
    %4 = vector.load %arg3[%c0_3, %c0_4] : memref<1x1024xf32, #tpu.memory_space<vmem>>, vector<1x1024xf32>
    %5 = vector.broadcast %4 : vector<1x1024xf32> to vector<8x1024xf32>
    %6 = arith.addf %3, %5 : vector<8x1024xf32>
    %cst_5 = arith.constant 0.000000e+00 : f32
    %7 = vector.broadcast %cst_5 : f32 to vector<8x1024xf32>
    %8 = arith.maximumf %6, %7 : vector<8x1024xf32>
    %9 = arith.truncf %8 : vector<8x1024xf32> to vector<8x1024xbf16>
    %c0_6 = arith.constant 0 : index
    %c0_7 = arith.constant 0 : index
    %10 = vector.load %arg4[%c0_6, %c0_7] : memref<1024x128xbf16, #tpu.memory_space<vmem>>, vector<1024x128xbf16>
    %cst_8 = arith.constant dense<0.000000e+00> : vector<8x128xf32>
    %11 = tpu.matmul %9, %10, %cst_8 {dimension_numbers = #tpu.dot_dimension_numbers<[1], [0], [0], [1], [0, 0, 1, 1], [], []>} : vector<8x1024xbf16>, vector<1024x128xbf16>, vector<8x128xf32> -> vector<8x128xf32>
    %c0_9 = arith.constant 0 : index
    %c0_10 = arith.constant 0 : index
    %12 = vector.load %arg5[%c0_9, %c0_10] : memref<1x128xf32, #tpu.memory_space<vmem>>, vector<1x128xf32>
    %13 = vector.broadcast %12 : vector<1x128xf32> to vector<8x128xf32>
    %14 = arith.addf %11, %13 : vector<8x128xf32>
    %c0_11 = arith.constant 0 : index
    %c0_12 = arith.constant 0 : index
    %15 = vector.load %arg6[%c0_11, %c0_12] : memref<8x128xf32, #tpu.memory_space<vmem>>, vector<8x128xf32>
    tpu.vector_store %arg6[%c0_11, %c0_12], %14 {strides = array<i32>} : memref<8x128xf32, #tpu.memory_space<vmem>>, vector<8x128xf32>,
    return
  }
  func.func @transform_0(%arg0: i32) -> (i32, i32) {
    %c0_i32 = arith.constant 0 : i32
    %c0_i32_0 = arith.constant 0 : i32
    return %arg0, %c0_i32 : i32, i32
  }
  func.func @transform_1(%arg0: i32) -> (i32, i32) {
    %c0_i32 = arith.constant 0 : i32
    %c0_i32_0 = arith.constant 0 : i32
    %c0_i32_1 = arith.constant 0 : i32
    return %c0_i32, %c0_i32_0 : i32, i32
  }
  func.func @transform_2(%arg0: i32) -> (i32, i32) {
    %c0_i32 = arith.constant 0 : i32
    %c0_i32_0 = arith.constant 0 : i32
    %c0_i32_1 = arith.constant 0 : i32
    return %c0_i32, %c0_i32_0 : i32, i32
  }
  func.func @transform_3(%arg0: i32) -> (i32, i32) {
    %c0_i32 = arith.constant 0 : i32
    %c0_i32_0 = arith.constant 0 : i32
    %c0_i32_1 = arith.constant 0 : i32
    return %c0_i32, %c0_i32_0 : i32, i32
  }
  func.func @transform_4(%arg0: i32) -> (i32, i32) {
    %c0_i32 = arith.constant 0 : i32
    %c0_i32_0 = arith.constant 0 : i32
    %c0_i32_1 = arith.constant 0 : i32
    return %c0_i32, %c0_i32_0 : i32, i32
  }
  func.func @transform_5(%arg0: i32) -> (i32, i32) {
    %c0_i32 = arith.constant 0 : i32
    %c0_i32_0 = arith.constant 0 : i32
    return %arg0, %c0_i32 : i32, i32
  }
}

</mosaic_0001>

<bundles_post_ra>
// kernel: mlp_forward.1
= control target key start
LH: loop header
LB: loop body
LE: loop exit
PB: predicated region body
PF: predicated region fallthrough
CT: control target
= control target key end

     0   :  { %10 = vsyncpa [#allocation3], 0  ;;  %s5612_s0 = inlined_call_operand.hbm [shape: f32[8,1024], index: 0, kind: input, shape index: {}]   ;;  %s5613_s1 = inlined_call_operand.hbm [shape: bf16[1024,1024], index: 1, kind: input, shape index: {}]   ;;  %s5614_s2 = inlined_call_operand.hbm [shape: f32[1,1024], index: 2, kind: input, shape index: {}]   ;;  %s5615_s3 = inlined_call_operand.hbm [shape: bf16[1024,128], index: 3, kind: input, shape index: {}]   ;;  %s5616_s4 = inlined_call_operand.hbm [shape: f32[1,128], index: 4, kind: input, shape index: {}]   ;;  %s5617_s5 = inlined_call_operand.hbm [shape: f32[8,128], index: 5, kind: output, shape index: {}]  }
   0x1   :  { %11 = vsyncpa [#allocation6], 0 }
   0x2   :  { %12 = vsyncpa [#allocation9], 0 }
   0x3   :  { %13 = vsyncpa [#allocation4], 0  ;;  %s5451_s18 = smov [#allocation5]  }
   0x4   :  { %s29_s19 = sshll.u32 %s5451_s18, 4  ;;  %s30_s19 = int_to_ptr.vmem [resolvable:$true] %s29_s19 }
   0x5   :  { %s5331_s20 = scalar_lea.vmem %s30_s19, 65536  ;;  %p5336_p1 = scmp.lt.s32.totalorder %s30_s19, %s30_s19 }
   0x6   :  { %p5332_p0 = scmp.ne.s32.totalorder %s30_s19, %s5331_s20  ;;  %p5337_p2 = scmp.lt.s32.totalorder %s5331_s20, %s5331_s20 }
   0x8   :  { %p5338_p3 = por %p5337_p2, %p5336_p1 }
   0xa   :  { %p5339_p4 = pnand %p5338_p3, %p5332_p0 }
   0xc   :  { %5342 = shalt.err (!%p5339_p4)
}
   0xd   :  { %s5452_s21 = smov 512   ;;  %s5453_s22 = smov 32  }
   0xe   :  { %35 = dma.hbm_to_vmem [thread:$0]  %s5613_s1, 65536, %s30_s19, [#allocation6], %s5452_s21, %s5452_s21, %s5453_s22  }
   0xf   :  { %s5454_s25 = smov [#allocation8]  }
  0x10   :  { %s51_s26 = sshll.u32 %s5454_s25, 4  ;;  %s52_s26 = int_to_ptr.vmem [resolvable:$true] %s51_s26 }
  0x11   :  { %s5351_s27 = scalar_lea.vmem %s52_s26, 8192  ;;  %p5356_p6 = scmp.lt.s32.totalorder %s52_s26, %s52_s26 }
  0x12   :  { %p5352_p5 = scmp.ne.s32.totalorder %s52_s26, %s5351_s27  ;;  %p5357_p7 = scmp.lt.s32.totalorder %s5351_s27, %s5351_s27 }
  0x14   :  { %p5358_p8 = por %p5357_p7, %p5356_p6 }
  0x16   :  { %p5359_p9 = pnand %p5358_p8, %p5352_p5 }
  0x18   :  { %5362 = shalt.err (!%p5359_p9)
}
  0x19   :  { %s5455_s28 = smov 64   ;;  %s5456_s29 = smov 4  }
  0x1a   :  { %57 = dma.hbm_to_vmem [thread:$0]  %s5615_s3, 8192, %s52_s26, [#allocation9], %s5455_s28, %s5455_s28, %s5456_s29  }
  0x1b   :  { %s5457_s7 = smov [#allocation2]   ;;  %s5458_s9 = smov [#allocation7]  }
  0x1c   :  { %s20_s8 = sshll.u32 %s5457_s7, 4  ;;  %s42_s1 = sshll.u32 %s5458_s9, 4  ;;  %s21_s8 = int_to_ptr.vmem [resolvable:$true] %s20_s8  ;;  %s43_s1 = int_to_ptr.vmem [resolvable:$true] %s42_s1 }
  0x1d   :  { %s5371_s10 = scalar_lea.vmem %s21_s8, 1024  ;;  %p5376_p11 = scmp.lt.s32.totalorder %s21_s8, %s21_s8 }
  0x1e   :  { %p5372_p10 = scmp.ne.s32.totalorder %s21_s8, %s5371_s10  ;;  %p5377_p12 = scmp.lt.s32.totalorder %s5371_s10, %s5371_s10 }
  0x20   :  { %p5378_p13 = por %p5377_p12, %p5376_p11 }
  0x22   :  { %p5379_p0 = pnand %p5378_p13, %p5372_p10 }
  0x24   :  { %5382 = shalt.err (!%p5379_p0)
}
  0x25   :  { %23 = dma.hbm_to_vmem [thread:$0]  %s5612_s0, 1024, %s21_s8, [#allocation3]  }
  0x26   :  { %s5391_s13 = scalar_lea.vmem %s43_s1, 128  ;;  %p5396_p2 = scmp.lt.s32.totalorder %s43_s1, %s43_s1 }
  0x27   :  { %p5392_p1 = scmp.ne.s32.totalorder %s43_s1, %s5391_s13  ;;  %p5397_p3 = scmp.lt.s32.totalorder %s5391_s13, %s5391_s13 }
  0x29   :  { %p5398_p4 = por %p5397_p3, %p5396_p2 }
  0x2b   :  { %p5399_p5 = pnand %p5398_p4, %p5392_p1 }
  0x2d   :  { %5402 = shalt.err (!%p5399_p5)
}
  0x2e   :  { %45 = dma.hbm_to_vmem [thread:$0]  %s5614_s2, 128, %s43_s1, [#allocation6]  }
  0x2f   :  { %s5459_s15 = smov [#allocation10]  }
  0x30   :  { %s64_s16 = sshll.u32 %s5459_s15, 4  ;;  %s65_s16 = int_to_ptr.vmem [resolvable:$true] %s64_s16 }
  0x31   :  { %s5411_s17 = scalar_lea.vmem %s65_s16, 16  ;;  %s5415_s18 = scalar_lea.vmem %s65_s16, 32 }
  0x32   :  { %p5412_p6 = scmp.ne.s32.totalorder %s65_s16, %s5411_s17  ;;  %p5416_p7 = scmp.lt.s32.totalorder %s65_s16, %s65_s16 }
  0x33   :  { %p5417_p8 = scmp.lt.s32.totalorder %s5415_s18, %s5411_s17 }
  0x35   :  { %p5418_p9 = por %p5417_p8, %p5416_p7 }
  0x37   :  { %p5419_p10 = pnand %p5418_p9, %p5412_p6 }
  0x39   :  { %5422 = shalt.err (!%p5419_p10)
}
  0x3a   :  { %67 = dma.hbm_to_vmem [thread:$0]  %s5616_s4, 16, %s65_s16, [#allocation9]  }
  0x3b   :  { %5443 = dma.done.wait [#allocation3], 1024  }
  0x3c   :  { %5444 = vsyncadd [#allocation3], 4294966272 }
  0x3d   :  { %5445 = dma.done.wait [#allocation6], 65664  }
  0x3e   :  { %5446 = vsyncadd [#allocation6], 4294901632 }
  0x3f   :  { %5447 = dma.done.wait [#allocation9], 8208  }
  0x40   :  { %5448 = vsyncadd [#allocation9], 4294959088  ;;  %v156_v0 = vld [vmem:[#allocation5 + $0x1c0] sm:$0xff]  ;;  %v85_v53 = vld [vmem:[#allocation2 + $0x8] sm:$0xff]  ;;  %s5460_s2 = smov [#allocation11]  }
  0x41   :  { %v160_v1 = vld [vmem:[#allocation5 + $0x1e0] sm:$0xff]  ;;  %v87_v54 = vld [vmem:[#allocation2 + $0x18] sm:$0xff]  ;;  %v5506_v58 = vpack.c.bf16 %v85_v53, %v85_v53  ;;  %s4572_s4 = sshll.u32 %s5460_s2, 4  ;;  %s4573_s4 = int_to_ptr.vmem [resolvable:$true] %s4572_s4 }
  0x42   :  { %v284_v2 = vld [vmem:[#allocation5 + $0x5c0] sm:$0xff]  ;;  %v4640_v3 = vcombine.high %v156_v0, %v160_v1  ;;  %v4639_v5 = vcombine.low %v156_v0, %v160_v1  ;;  %v5508_v59 = vpack.c.bf16 %v87_v54, %v87_v54  ;;  %s5423_s20 = scalar_lea.vmem %s4573_s4, 128  ;;  %p5428_p12 = scmp.lt.s32.totalorder %s4573_s4, %s4573_s4 }
  0x43   :  { %v288_v4 = vld [vmem:[#allocation5 + $0x5e0] sm:$0xff]  ;;  %3246 = vmatprep.mubr.bf16.mxu0 %v5506_v58  ;;  %p5424_p11 = scmp.ne.s32.totalorder %s4573_s4, %s5423_s20  ;;  %p5429_p13 = scmp.lt.s32.totalorder %s5423_s20, %s5423_s20 }
  0x44   :  { %v148_v6 = vld [vmem:[#allocation5 + $0x180] sm:$0xff]  ;;  %v4768_v8 = vcombine.high %v284_v2, %v288_v4  ;;  %v4767_v9 = vcombine.low %v284_v2, %v288_v4  ;;  %3214 = vmatprep.subr.bf16.mxu0 %v4640_v3  ;;  %3287 = vmatprep.mubr.bf16.mxu1 %v5508_v59 }
  0x45   :  { %v152_v7 = vld [vmem:[#allocation5 + $0x1a0] sm:$0xff]  ;;  %3215 = vmatpush1.bf16.msra.mxu0 %v4639_v5  ;;  %p5430_p0 = por %p5429_p13, %p5428_p12 }
  0x46   :  { %v4632_v10 = vcombine.high %v148_v6, %v152_v7  ;;  %v276_v11 = vld [vmem:[#allocation5 + $0x580] sm:$0xff]  ;;  %3255 = vmatprep.subr.bf16.mxu1 %v4768_v8  ;;  %v4631_v18 = vcombine.low %v148_v6, %v152_v7 }
  0x47   :  { %v280_v12 = vld [vmem:[#allocation5 + $0x5a0] sm:$0xff]  ;;  %3256 = vmatpush1.bf16.msra.mxu1 %v4767_v9  ;;  %p5431_p1 = pnand %p5430_p0, %p5424_p11 }
  0x48   :  { %v140_v13 = vld [vmem:[#allocation5 + $0x140] sm:$0xff]  ;;  %v4760_v14 = vcombine.high %v276_v11, %v280_v12  ;;  %3216 = vmatprep.subr.bf16.mxu0 %v4632_v10  ;;  %v4759_v19 = vcombine.low %v276_v11, %v280_v12 }
  0x49   :  { %v144_v15 = vld [vmem:[#allocation5 + $0x160] sm:$0xff]  ;;  %3217 = vmatpush1.bf16.msra.mxu0 %v4631_v18 }
  0x4a   :  { %v268_v16 = vld [vmem:[#allocation5 + $0x540] sm:$0xff]  ;;  %v4624_v20 = vcombine.high %v140_v13, %v144_v15  ;;  %3257 = vmatprep.subr.bf16.mxu1 %v4760_v14  ;;  %v4623_v26 = vcombine.low %v140_v13, %v144_v15 }
  0x4b   :  { %v272_v17 = vld [vmem:[#allocation5 + $0x560] sm:$0xff]  ;;  %3258 = vmatpush1.bf16.msra.mxu1 %v4759_v19 }
  0x4c   :  { %v4752_v21 = vcombine.high %v268_v16, %v272_v17  ;;  %v132_v22 = vld [vmem:[#allocation5 + $0x100] sm:$0xff]  ;;  %3218 = vmatprep.subr.bf16.mxu0 %v4624_v20  ;;  %v4751_v27 = vcombine.low %v268_v16, %v272_v17 }
  0x4d   :  { %v136_v23 = vld [vmem:[#allocation5 + $0x120] sm:$0xff]  ;;  %3219 = vmatpush1.bf16.msra.mxu0 %v4623_v26 }
  0x4e   :  { %v260_v24 = vld [vmem:[#allocation5 + $0x500] sm:$0xff]  ;;  %v4616_v28 = vcombine.high %v132_v22, %v136_v23  ;;  %3259 = vmatprep.subr.bf16.mxu1 %v4752_v21  ;;  %v4615_v34 = vcombine.low %v132_v22, %v136_v23 }
  0x4f   :  { %v264_v25 = vld [vmem:[#allocation5 + $0x520] sm:$0xff]  ;;  %3260 = vmatpush1.bf16.msra.mxu1 %v4751_v27 }
  0x50   :  { %v4744_v29 = vcombine.high %v260_v24, %v264_v25  ;;  %v124_v30 = vld [vmem:[#allocation5 + $0xc0] sm:$0xff]  ;;  %3220 = vmatprep.subr.bf16.mxu0 %v4616_v28  ;;  %v4743_v35 = vcombine.low %v260_v24, %v264_v25 }
  0x51   :  { %v128_v31 = vld [vmem:[#allocation5 + $0xe0] sm:$0xff]  ;;  %3221 = vmatpush1.bf16.msra.mxu0 %v4615_v34 }
  0x52   :  { %v252_v32 = vld [vmem:[#allocation5 + $0x4c0] sm:$0xff]  ;;  %v4608_v36 = vcombine.high %v124_v30, %v128_v31  ;;  %3261 = vmatprep.subr.bf16.mxu1 %v4744_v29  ;;  %v4607_v42 = vcombine.low %v124_v30, %v128_v31 }
  0x53   :  { %v256_v33 = vld [vmem:[#allocation5 + $0x4e0] sm:$0xff]  ;;  %3262 = vmatpush1.bf16.msra.mxu1 %v4743_v35 }
  0x54   :  { %v4736_v37 = vcombine.high %v252_v32, %v256_v33  ;;  %v116_v38 = vld [vmem:[#allocation5 + $0x80] sm:$0xff]  ;;  %3222 = vmatprep.subr.bf16.mxu0 %v4608_v36  ;;  %v4735_v43 = vcombine.low %v252_v32, %v256_v33 }
  0x55   :  { %v120_v39 = vld [vmem:[#allocation5 + $0xa0] sm:$0xff]  ;;  %3223 = vmatpush1.bf16.msra.mxu0 %v4607_v42 }
  0x56   :  { %v244_v40 = vld [vmem:[#allocation5 + $0x480] sm:$0xff]  ;;  %v4600_v44 = vcombine.high %v116_v38, %v120_v39  ;;  %3263 = vmatprep.subr.bf16.mxu1 %v4736_v37  ;;  %v4599_v50 = vcombine.low %v116_v38, %v120_v39 }
  0x57   :  { %v248_v41 = vld [vmem:[#allocation5 + $0x4a0] sm:$0xff]  ;;  %3264 = vmatpush1.bf16.msra.mxu1 %v4735_v43 }
  0x58   :  { %v4728_v45 = vcombine.high %v244_v40, %v248_v41  ;;  %v108_v46 = vld [vmem:[#allocation5 + $0x40] sm:$0xff]  ;;  %3224 = vmatprep.subr.bf16.mxu0 %v4600_v44  ;;  %v4727_v51 = vcombine.low %v244_v40, %v248_v41 }
  0x59   :  { %v112_v47 = vld [vmem:[#allocation5 + $0x60] sm:$0xff]  ;;  %3225 = vmatpush1.bf16.msra.mxu0 %v4599_v50 }
  0x5a   :  { %v236_v48 = vld [vmem:[#allocation5 + $0x440] sm:$0xff]  ;;  %v4592_v52 = vcombine.high %v108_v46, %v112_v47  ;;  %3265 = vmatprep.subr.bf16.mxu1 %v4728_v45  ;;  %v4591_v62 = vcombine.low %v108_v46, %v112_v47 }
  0x5b   :  { %v240_v49 = vld [vmem:[#allocation5 + $0x460] sm:$0xff]  ;;  %3266 = vmatpush1.bf16.msra.mxu1 %v4727_v51 }
  0x5c   :  { %v4720_v55 = vcombine.high %v236_v48, %v240_v49  ;;  %v100_v56 = vld [vmem:[#allocation5] sm:$0xff]  ;;  %3226 = vmatprep.subr.bf16.mxu0 %v4592_v52  ;;  %v4719_v63 = vcombine.low %v236_v48, %v240_v49 }
  0x5d   :  { %v104_v57 = vld [vmem:[#allocation5 + $0x20] sm:$0xff]  ;;  %3227 = vmatpush1.bf16.msra.mxu0 %v4591_v62 }
  0x5e   :  { %v228_v60 = vld [vmem:[#allocation5 + $0x400] sm:$0xff]  ;;  %v4584_v0 = vcombine.high %v100_v56, %v104_v57  ;;  %3267 = vmatprep.subr.bf16.mxu1 %v4720_v55  ;;  %v4583_v6 = vcombine.low %v100_v56, %v104_v57 }
  0x5f   :  { %v232_v61 = vld [vmem:[#allocation5 + $0x420] sm:$0xff]  ;;  %3268 = vmatpush1.bf16.msra.mxu1 %v4719_v63 }
  0x60   :  { %v4712_v1 = vcombine.high %v228_v60, %v232_v61  ;;  %v220_v2 = vld [vmem:[#allocation5 + $0x3c0] sm:$0xff]  ;;  %3228 = vmatprep.subr.bf16.mxu0 %v4584_v0  ;;  %v4711_v7 = vcombine.low %v228_v60, %v232_v61 }
  0x61   :  { %v224_v3 = vld [vmem:[#allocation5 + $0x3e0] sm:$0xff]  ;;  %3229 = vmatpush1.bf16.msra.mxu0 %v4583_v6 }
  0x62   :  { %v348_v4 = vld [vmem:[#allocation5 + $0x7c0] sm:$0xff]  ;;  %v4704_v8 = vcombine.high %v220_v2, %v224_v3  ;;  %3269 = vmatprep.subr.bf16.mxu1 %v4712_v1  ;;  %v4703_v14 = vcombine.low %v220_v2, %v224_v3 }
  0x63   :  { %v352_v5 = vld [vmem:[#allocation5 + $0x7e0] sm:$0xff]  ;;  %3270 = vmatpush1.bf16.msra.mxu1 %v4711_v7 }
  0x64   :  { %v4832_v9 = vcombine.high %v348_v4, %v352_v5  ;;  %v212_v10 = vld [vmem:[#allocation5 + $0x380] sm:$0xff]  ;;  %3230 = vmatprep.subr.bf16.mxu0 %v4704_v8  ;;  %v4831_v15 = vcombine.low %v348_v4, %v352_v5 }
  0x65   :  { %v216_v11 = vld [vmem:[#allocation5 + $0x3a0] sm:$0xff]  ;;  %3231 = vmatpush2.bf16.msra.mxu0 %v4703_v14 }
  0x66   :  { %v340_v12 = vld [vmem:[#allocation5 + $0x780] sm:$0xff]  ;;  %v4696_v16 = vcombine.high %v212_v10, %v216_v11  ;;  %3271 = vmatprep.subr.bf16.mxu1 %v4832_v9  ;;  %v4695_v22 = vcombine.low %v212_v10, %v216_v11  ;;  %v86_v11 = vld [vmem:[#allocation2 + $0x10] sm:$0xff] }
  0x67   :  { %v344_v13 = vld [vmem:[#allocation5 + $0x7a0] sm:$0xff]  ;;  %3272 = vmatpush2.bf16.msra.mxu1 %v4831_v15 }
  0x68   :  { %v4824_v17 = vcombine.high %v340_v12, %v344_v13  ;;  %v204_v18 = vld [vmem:[#allocation5 + $0x340] sm:$0xff]  ;;  %3232 = vmatprep.subr.bf16.mxu0 %v4696_v16  ;;  %v4823_v23 = vcombine.low %v340_v12, %v344_v13 }
  0x69   :  { %v208_v19 = vld [vmem:[#allocation5 + $0x360] sm:$0xff]  ;;  %3233 = vmatpush2.bf16.msra.mxu0 %v4695_v22  ;;  %v91_v22 = vld [vmem:[#allocation2 + $0x38] sm:$0xff] }
  0x6a   :  { %v332_v20 = vld [vmem:[#allocation5 + $0x740] sm:$0xff]  ;;  %v4688_v24 = vcombine.high %v204_v18, %v208_v19  ;;  %3273 = vmatprep.subr.bf16.mxu1 %v4824_v17  ;;  %v4687_v30 = vcombine.low %v204_v18, %v208_v19  ;;  %v89_v19 = vld [vmem:[#allocation2 + $0x28] sm:$0xff] }
  0x6b   :  { %v336_v21 = vld [vmem:[#allocation5 + $0x760] sm:$0xff]  ;;  %3274 = vmatpush2.bf16.msra.mxu1 %v4823_v23 }
  0x6c   :  { %v4816_v25 = vcombine.high %v332_v20, %v336_v21  ;;  %v196_v26 = vld [vmem:[#allocation5 + $0x300] sm:$0xff]  ;;  %3234 = vmatprep.subr.bf16.mxu0 %v4688_v24  ;;  %v4815_v31 = vcombine.low %v332_v20, %v336_v21  ;;  %v5514_v20 = vpack.c.bf16 %v86_v11, %v86_v11 }
  0x6d   :  { %v200_v27 = vld [vmem:[#allocation5 + $0x320] sm:$0xff]  ;;  %3235 = vmatpush2.bf16.msra.mxu0 %v4687_v30 }
  0x6e   :  { %v324_v28 = vld [vmem:[#allocation5 + $0x700] sm:$0xff]  ;;  %v4680_v32 = vcombine.high %v196_v26, %v200_v27  ;;  %3275 = vmatprep.subr.bf16.mxu1 %v4816_v25  ;;  %v4679_v38 = vcombine.low %v196_v26, %v200_v27 }
  0x6f   :  { %v328_v29 = vld [vmem:[#allocation5 + $0x720] sm:$0xff]  ;;  %3276 = vmatpush2.bf16.msra.mxu1 %v4815_v31  ;;  %v5519_v31 = vpack.c.bf16 %v91_v22, %v91_v22 }
  0x70   :  { %v4808_v33 = vcombine.high %v324_v28, %v328_v29  ;;  %v188_v34 = vld [vmem:[#allocation5 + $0x2c0] sm:$0xff]  ;;  %3236 = vmatprep.subr.bf16.mxu0 %v4680_v32  ;;  %v4807_v39 = vcombine.low %v324_v28, %v328_v29  ;;  %v5516_v28 = vpack.c.bf16 %v89_v19, %v89_v19 }
  0x71   :  { %v192_v35 = vld [vmem:[#allocation5 + $0x2e0] sm:$0xff]  ;;  %3237 = vmatpush2.bf16.msra.mxu0 %v4679_v38 }
  0x72   :  { %v316_v36 = vld [vmem:[#allocation5 + $0x6c0] sm:$0xff]  ;;  %v4672_v40 = vcombine.high %v188_v34, %v192_v35  ;;  %3277 = vmatprep.subr.bf16.mxu1 %v4808_v33  ;;  %v4671_v46 = vcombine.low %v188_v34, %v192_v35 }
  0x73   :  { %v320_v37 = vld [vmem:[#allocation5 + $0x6e0] sm:$0xff]  ;;  %3278 = vmatpush2.bf16.msra.mxu1 %v4807_v39 }
  0x74   :  { %v4800_v41 = vcombine.high %v316_v36, %v320_v37  ;;  %v180_v42 = vld [vmem:[#allocation5 + $0x280] sm:$0xff]  ;;  %3238 = vmatprep.subr.bf16.mxu0 %v4672_v40  ;;  %v4799_v47 = vcombine.low %v316_v36, %v320_v37 }
  0x75   :  { %v184_v43 = vld [vmem:[#allocation5 + $0x2a0] sm:$0xff]  ;;  %3239 = vmatpush2.bf16.msra.mxu0 %v4671_v46 }
  0x76   :  { %v308_v44 = vld [vmem:[#allocation5 + $0x680] sm:$0xff]  ;;  %v4664_v48 = vcombine.high %v180_v42, %v184_v43  ;;  %3279 = vmatprep.subr.bf16.mxu1 %v4800_v41  ;;  %v4663_v54 = vcombine.low %v180_v42, %v184_v43 }
  0x77   :  { %v312_v45 = vld [vmem:[#allocation5 + $0x6a0] sm:$0xff]  ;;  %3280 = vmatpush2.bf16.msra.mxu1 %v4799_v47 }
  0x78   :  { %v4792_v49 = vcombine.high %v308_v44, %v312_v45  ;;  %v172_v50 = vld [vmem:[#allocation5 + $0x240] sm:$0xff]  ;;  %3240 = vmatprep.subr.bf16.mxu0 %v4664_v48  ;;  %v4791_v55 = vcombine.low %v308_v44, %v312_v45 }
  0x79   :  { %v176_v51 = vld [vmem:[#allocation5 + $0x260] sm:$0xff]  ;;  %3241 = vmatpush2.bf16.msra.mxu0 %v4663_v54 }
  0x7a   :  { %v300_v52 = vld [vmem:[#allocation5 + $0x640] sm:$0xff]  ;;  %v4656_v56 = vcombine.high %v172_v50, %v176_v51  ;;  %3281 = vmatprep.subr.bf16.mxu1 %v4792_v49  ;;  %v4655_v0 = vcombine.low %v172_v50, %v176_v51 }
  0x7b   :  { %v304_v53 = vld [vmem:[#allocation5 + $0x660] sm:$0xff]  ;;  %3282 = vmatpush2.bf16.msra.mxu1 %v4791_v55 }
  0x7c   :  { %v4784_v57 = vcombine.high %v300_v52, %v304_v53  ;;  %v164_v60 = vld [vmem:[#allocation5 + $0x200] sm:$0xff]  ;;  %3242 = vmatprep.subr.bf16.mxu0 %v4656_v56  ;;  %v4783_v1 = vcombine.low %v300_v52, %v304_v53 }
  0x7d   :  { %v168_v61 = vld [vmem:[#allocation5 + $0x220] sm:$0xff]  ;;  %3243 = vmatpush2.bf16.msra.mxu0 %v4655_v0 }
  0x7e   :  { %v292_v62 = vld [vmem:[#allocation5 + $0x600] sm:$0xff]  ;;  %v4648_v2 = vcombine.high %v164_v60, %v168_v61  ;;  %3283 = vmatprep.subr.bf16.mxu1 %v4784_v57  ;;  %v4647_v8 = vcombine.low %v164_v60, %v168_v61 }
  0x7f   :  { %v296_v63 = vld [vmem:[#allocation5 + $0x620] sm:$0xff]  ;;  %3284 = vmatpush2.bf16.msra.mxu1 %v4783_v1 }
  0x80   :  { %v4776_v3 = vcombine.high %v292_v62, %v296_v63  ;;  %v412_v4 = vld [vmem:[#allocation5 + $0x9c0] sm:$0xff]  ;;  %3244 = vmatprep.subr.bf16.mxu0 %v4648_v2  ;;  %v4775_v10 = vcombine.low %v292_v62, %v296_v63 }
  0x81   :  { %v416_v5 = vld [vmem:[#allocation5 + $0x9e0] sm:$0xff]  ;;  %3245 = vmatpush2.bf16.msra.mxu0 %v4647_v8 }
  0x82   :  { %v540_v6 = vld [vmem:[#allocation5 + $0xdc0] sm:$0xff]  ;;  %v4896_v12 = vcombine.high %v412_v4, %v416_v5  ;;  %3285 = vmatprep.subr.bf16.mxu1 %v4776_v3  ;;  %v4895_v21 = vcombine.low %v412_v4, %v416_v5 }
  0x83   :  { %v544_v7 = vld [vmem:[#allocation5 + $0xde0] sm:$0xff]  ;;  %3286 = vmatpush2.bf16.msra.mxu1 %v4775_v10 }
  0x84   :  { %v84_v9 = vld [vmem:[#allocation2] sm:$0xff]  ;;  %v5024_v13 = vcombine.high %v540_v6, %v544_v7  ;;  %3296 = vmatprep.subr.bf16.mxu0 %v4896_v12  ;;  %v5023_v23 = vcombine.low %v540_v6, %v544_v7 }
  0x85   :  { %v404_v14 = vld [vmem:[#allocation5 + $0x980] sm:$0xff]  ;;  %v5512_v16 = vpack.c.bf16 %v84_v9, %v84_v9 }
  0x86   :  { %v408_v15 = vld [vmem:[#allocation5 + $0x9a0] sm:$0xff]  ;;  %3337 = vmatprep.subr.bf16.mxu1 %v5024_v13  ;;  %3288 = vmatmul.mubr.bf16.vlgmr.msra.gmra.mxu1 %v5514_v20 }
  0x87   :  { %v532_v17 = vld [vmem:[#allocation5 + $0xd80] sm:$0xff]  ;;  %v4888_v24 = vcombine.high %v404_v14, %v408_v15  ;;  %3247 = vmatmul.mubr.bf16.vlgmr.msra.gmra.mxu0 %v5512_v16  ;;  %v4887_v32 = vcombine.low %v404_v14, %v408_v15  ;;  %3338 = vmatpush1.bf16.msra.mxu1 %v5023_v23 }
  0x88   :  { %v536_v18 = vld [vmem:[#allocation5 + $0xda0] sm:$0xff]  ;;  %3297 = vmatpush1.bf16.msra.mxu0 %v4895_v21  ;;  %3328 = vmatprep.mubr.bf16.mxu0 %v5516_v28 }
  0x89   :  { %v5016_v25 = vcombine.high %v532_v17, %v536_v18  ;;  %v396_v26 = vld [vmem:[#allocation5 + $0x940] sm:$0xff]  ;;  %3298 = vmatprep.subr.bf16.mxu0 %v4888_v24  ;;  %v5015_v33 = vcombine.low %v532_v17, %v536_v18  ;;  %3369 = vmatprep.mubr.bf16.mxu1 %v5519_v31 }
  0x8a   :  { %v400_v27 = vld [vmem:[#allocation5 + $0x960] sm:$0xff] }
  0x8b   :  { %v524_v29 = vld [vmem:[#allocation5 + $0xd40] sm:$0xff]  ;;  %v4880_v34 = vcombine.high %v396_v26, %v400_v27  ;;  %3339 = vmatprep.subr.bf16.mxu1 %v5016_v25  ;;  %v4879_v40 = vcombine.low %v396_v26, %v400_v27 }
  0x8c   :  { %v528_v30 = vld [vmem:[#allocation5 + $0xd60] sm:$0xff]  ;;  %3299 = vmatpush1.bf16.msra.mxu0 %v4887_v32  ;;  %3340 = vmatpush1.bf16.msra.mxu1 %v5015_v33 }
  0x8d   :  { %v388_v35 = vld [vmem:[#allocation5 + $0x900] sm:$0xff]  ;;  %v5008_v38 = vcombine.high %v524_v29, %v528_v30  ;;  %3300 = vmatprep.subr.bf16.mxu0 %v4880_v34  ;;  %v5007_v41 = vcombine.low %v524_v29, %v528_v30 }
  0x8e   :  { %v392_v36 = vld [vmem:[#allocation5 + $0x920] sm:$0xff] }
  0x8f   :  { %v516_v37 = vld [vmem:[#allocation5 + $0xd00] sm:$0xff]  ;;  %v4872_v42 = vcombine.high %v388_v35, %v392_v36  ;;  %3341 = vmatprep.subr.bf16.mxu1 %v5008_v38  ;;  %v4871_v48 = vcombine.low %v388_v35, %v392_v36 }
  0x90   :  { %v520_v39 = vld [vmem:[#allocation5 + $0xd20] sm:$0xff]  ;;  %3301 = vmatpush1.bf16.msra.mxu0 %v4879_v40  ;;  %3342 = vmatpush1.bf16.msra.mxu1 %v5007_v41 }
  0x91   :  { %v380_v43 = vld [vmem:[#allocation5 + $0x8c0] sm:$0xff]  ;;  %v5000_v46 = vcombine.high %v516_v37, %v520_v39  ;;  %3302 = vmatprep.subr.bf16.mxu0 %v4872_v42  ;;  %v4999_v49 = vcombine.low %v516_v37, %v520_v39 }
  0x92   :  { %v384_v44 = vld [vmem:[#allocation5 + $0x8e0] sm:$0xff] }
  0x93   :  { %v508_v45 = vld [vmem:[#allocation5 + $0xcc0] sm:$0xff]  ;;  %v4864_v50 = vcombine.high %v380_v43, %v384_v44  ;;  %3343 = vmatprep.subr.bf16.mxu1 %v5000_v46  ;;  %v4863_v56 = vcombine.low %v380_v43, %v384_v44 }
  0x94   :  { %v512_v47 = vld [vmem:[#allocation5 + $0xce0] sm:$0xff]  ;;  %3303 = vmatpush1.bf16.msra.mxu0 %v4871_v48  ;;  %3344 = vmatpush1.bf16.msra.mxu1 %v4999_v49 }
  0x95   :  { %v372_v51 = vld [vmem:[#allocation5 + $0x880] sm:$0xff]  ;;  %v4992_v54 = vcombine.high %v508_v45, %v512_v47  ;;  %3304 = vmatprep.subr.bf16.mxu0 %v4864_v50  ;;  %v4991_v57 = vcombine.low %v508_v45, %v512_v47 }
  0x96   :  { %v376_v52 = vld [vmem:[#allocation5 + $0x8a0] sm:$0xff] }
  0x97   :  { %v500_v53 = vld [vmem:[#allocation5 + $0xc80] sm:$0xff]  ;;  %v4856_v60 = vcombine.high %v372_v51, %v376_v52  ;;  %3345 = vmatprep.subr.bf16.mxu1 %v4992_v54  ;;  %v4855_v2 = vcombine.low %v372_v51, %v376_v52 }
  0x98   :  { %v504_v55 = vld [vmem:[#allocation5 + $0xca0] sm:$0xff]  ;;  %3305 = vmatpush1.bf16.msra.mxu0 %v4863_v56  ;;  %3346 = vmatpush1.bf16.msra.mxu1 %v4991_v57 }
  0x99   :  { %v364_v61 = vld [vmem:[#allocation5 + $0x840] sm:$0xff]  ;;  %v4984_v0 = vcombine.high %v500_v53, %v504_v55  ;;  %3306 = vmatprep.subr.bf16.mxu0 %v4856_v60  ;;  %v4983_v3 = vcombine.low %v500_v53, %v504_v55 }
  0x9a   :  { %v368_v62 = vld [vmem:[#allocation5 + $0x860] sm:$0xff] }
  0x9b   :  { %v492_v63 = vld [vmem:[#allocation5 + $0xc40] sm:$0xff]  ;;  %v4848_v4 = vcombine.high %v364_v61, %v368_v62  ;;  %3347 = vmatprep.subr.bf16.mxu1 %v4984_v0  ;;  %v4847_v10 = vcombine.low %v364_v61, %v368_v62 }
  0x9c   :  { %v496_v1 = vld [vmem:[#allocation5 + $0xc60] sm:$0xff]  ;;  %3307 = vmatpush1.bf16.msra.mxu0 %v4855_v2  ;;  %3348 = vmatpush1.bf16.msra.mxu1 %v4983_v3 }
  0x9d   :  { %v356_v5 = vld [vmem:[#allocation5 + $0x800] sm:$0xff]  ;;  %v4976_v8 = vcombine.high %v492_v63, %v496_v1  ;;  %3308 = vmatprep.subr.bf16.mxu0 %v4848_v4  ;;  %v4975_v11 = vcombine.low %v492_v63, %v496_v1 }
  0x9e   :  { %v360_v6 = vld [vmem:[#allocation5 + $0x820] sm:$0xff] }
  0x9f   :  { %v484_v7 = vld [vmem:[#allocation5 + $0xc00] sm:$0xff]  ;;  %v4840_v12 = vcombine.high %v356_v5, %v360_v6  ;;  %3349 = vmatprep.subr.bf16.mxu1 %v4976_v8  ;;  %v4839_v19 = vcombine.low %v356_v5, %v360_v6 }
  0xa0   :  { %v488_v9 = vld [vmem:[#allocation5 + $0xc20] sm:$0xff]  ;;  %3309 = vmatpush1.bf16.msra.mxu0 %v4847_v10  ;;  %3350 = vmatpush1.bf16.msra.mxu1 %v4975_v11 }
  0xa1   :  { %v476_v13 = vld [vmem:[#allocation5 + $0xbc0] sm:$0xff]  ;;  %v4968_v17 = vcombine.high %v484_v7, %v488_v9  ;;  %3310 = vmatprep.subr.bf16.mxu0 %v4840_v12  ;;  %v4967_v21 = vcombine.low %v484_v7, %v488_v9 }
  0xa2   :  { %v480_v14 = vld [vmem:[#allocation5 + $0xbe0] sm:$0xff] }
  0xa3   :  { %v604_v15 = vld [vmem:[#allocation5 + $0xfc0] sm:$0xff]  ;;  %v4960_v22 = vcombine.high %v476_v13, %v480_v14  ;;  %3351 = vmatprep.subr.bf16.mxu1 %v4968_v17  ;;  %v4959_v29 = vcombine.low %v476_v13, %v480_v14 }
  0xa4   :  { %v608_v18 = vld [vmem:[#allocation5 + $0xfe0] sm:$0xff]  ;;  %3311 = vmatpush1.bf16.msra.mxu0 %v4839_v19  ;;  %3352 = vmatpush1.bf16.msra.mxu1 %v4967_v21  ;;  %v157_v21 = vld [vmem:[#allocation5 + $0x1c8] sm:$0xff] }
  0xa5   :  { %v468_v23 = vld [vmem:[#allocation5 + $0xb80] sm:$0xff]  ;;  %v5088_v26 = vcombine.high %v604_v15, %v608_v18  ;;  %3312 = vmatprep.subr.bf16.mxu0 %v4960_v22  ;;  %v5087_v30 = vcombine.low %v604_v15, %v608_v18  ;;  %v161_v22 = vld [vmem:[#allocation5 + $0x1e8] sm:$0xff] }
  0xa6   :  { %v472_v24 = vld [vmem:[#allocation5 + $0xba0] sm:$0xff] }
  0xa7   :  { %v596_v25 = vld [vmem:[#allocation5 + $0xf80] sm:$0xff]  ;;  %v4952_v32 = vcombine.high %v468_v23, %v472_v24  ;;  %3353 = vmatprep.subr.bf16.mxu1 %v5088_v26  ;;  %v4951_v38 = vcombine.low %v468_v23, %v472_v24  ;;  %v285_v23 = vld [vmem:[#allocation5 + $0x5c8] sm:$0xff] }
  0xa8   :  { %v600_v27 = vld [vmem:[#allocation5 + $0xfa0] sm:$0xff]  ;;  %3313 = vmatpush2.bf16.msra.mxu0 %v4959_v29  ;;  %3354 = vmatpush2.bf16.msra.mxu1 %v5087_v30  ;;  %v289_v26 = vld [vmem:[#allocation5 + $0x5e8] sm:$0xff] }
  0xa9   :  { %v460_v33 = vld [vmem:[#allocation5 + $0xb40] sm:$0xff]  ;;  %v5080_v36 = vcombine.high %v596_v25, %v600_v27  ;;  %3314 = vmatprep.subr.bf16.mxu0 %v4952_v32  ;;  %v5079_v39 = vcombine.low %v596_v25, %v600_v27  ;;  %v90_v27 = vld [vmem:[#allocation2 + $0x30] sm:$0xff]  ;;  %v4642_v32 = vcombine.high %v157_v21, %v161_v22 }
  0xaa   :  { %v464_v34 = vld [vmem:[#allocation5 + $0xb60] sm:$0xff] }
  0xab   :  { %v588_v35 = vld [vmem:[#allocation5 + $0xf40] sm:$0xff]  ;;  %v4944_v40 = vcombine.high %v460_v33, %v464_v34  ;;  %3355 = vmatprep.subr.bf16.mxu1 %v5080_v36  ;;  %v4943_v46 = vcombine.low %v460_v33, %v464_v34  ;;  %v149_v33 = vld [vmem:[#allocation5 + $0x188] sm:$0xff]  ;;  %v4770_v36 = vcombine.high %v285_v23, %v289_v26 }
  0xac   :  { %v592_v37 = vld [vmem:[#allocation5 + $0xf60] sm:$0xff]  ;;  %3315 = vmatpush2.bf16.msra.mxu0 %v4951_v38  ;;  %3356 = vmatpush2.bf16.msra.mxu1 %v5079_v39  ;;  %v153_v34 = vld [vmem:[#allocation5 + $0x1a8] sm:$0xff]  ;;  %v5526_v39 = vpack.c.bf16 %v90_v27, %v90_v27 }
  0xad   :  { %v452_v41 = vld [vmem:[#allocation5 + $0xb00] sm:$0xff]  ;;  %v5072_v44 = vcombine.high %v588_v35, %v592_v37  ;;  %3316 = vmatprep.subr.bf16.mxu0 %v4944_v40  ;;  %v5071_v47 = vcombine.low %v588_v35, %v592_v37  ;;  %v277_v35 = vld [vmem:[#allocation5 + $0x588] sm:$0xff]  ;;  %v4641_v40 = vcombine.low %v157_v21, %v161_v22 }
  0xae   :  { %v456_v42 = vld [vmem:[#allocation5 + $0xb20] sm:$0xff]  ;;  %v281_v37 = vld [vmem:[#allocation5 + $0x5a8] sm:$0xff] }
  0xaf   :  { %v580_v43 = vld [vmem:[#allocation5 + $0xf00] sm:$0xff]  ;;  %v4936_v48 = vcombine.high %v452_v41, %v456_v42  ;;  %3357 = vmatprep.subr.bf16.mxu1 %v5072_v44  ;;  %v4935_v54 = vcombine.low %v452_v41, %v456_v42  ;;  %v4769_v41 = vcombine.low %v285_v23, %v289_v26  ;;  %v4634_v42 = vcombine.high %v149_v33, %v153_v34  ;;  %v229_v26 = vld [vmem:[#allocation5 + $0x408] sm:$0xff] }
  0xb0   :  { %v584_v45 = vld [vmem:[#allocation5 + $0xf20] sm:$0xff]  ;;  %3317 = vmatpush2.bf16.msra.mxu0 %v4943_v46  ;;  %3358 = vmatpush2.bf16.msra.mxu1 %v5071_v47  ;;  %v4762_v44 = vcombine.high %v277_v35, %v281_v37  ;;  %v269_v46 = vld [vmem:[#allocation5 + $0x548] sm:$0xff] }
  0xb1   :  { %v444_v49 = vld [vmem:[#allocation5 + $0xac0] sm:$0xff]  ;;  %v5064_v52 = vcombine.high %v580_v43, %v584_v45  ;;  %3318 = vmatprep.subr.bf16.mxu0 %v4936_v48  ;;  %v5063_v55 = vcombine.low %v580_v43, %v584_v45  ;;  %v141_v43 = vld [vmem:[#allocation5 + $0x148] sm:$0xff]  ;;  %v4633_v48 = vcombine.low %v149_v33, %v153_v34 }
  0xb2   :  { %v448_v50 = vld [vmem:[#allocation5 + $0xae0] sm:$0xff]  ;;  %v145_v45 = vld [vmem:[#allocation5 + $0x168] sm:$0xff] }
  0xb3   :  { %v572_v51 = vld [vmem:[#allocation5 + $0xec0] sm:$0xff]  ;;  %v4928_v56 = vcombine.high %v444_v49, %v448_v50  ;;  %3359 = vmatprep.subr.bf16.mxu1 %v5064_v52  ;;  %v4927_v0 = vcombine.low %v444_v49, %v448_v50  ;;  %v273_v47 = vld [vmem:[#allocation5 + $0x568] sm:$0xff]  ;;  %v4761_v49 = vcombine.low %v277_v35, %v281_v37  ;;  %v4626_v50 = vcombine.high %v141_v43, %v145_v45 }
  0xb4   :  { %v576_v53 = vld [vmem:[#allocation5 + $0xee0] sm:$0xff]  ;;  %3319 = vmatpush2.bf16.msra.mxu0 %v4935_v54  ;;  %3360 = vmatpush2.bf16.msra.mxu1 %v5063_v55  ;;  %v133_v52 = vld [vmem:[#allocation5 + $0x108] sm:$0xff] }
  0xb5   :  { %v436_v57 = vld [vmem:[#allocation5 + $0xa80] sm:$0xff]  ;;  %v5056_v62 = vcombine.high %v572_v51, %v576_v53  ;;  %3320 = vmatprep.subr.bf16.mxu0 %v4928_v56  ;;  %v5055_v1 = vcombine.low %v572_v51, %v576_v53  ;;  %v4754_v51 = vcombine.high %v269_v46, %v273_v47  ;;  %v137_v53 = vld [vmem:[#allocation5 + $0x128] sm:$0xff]  ;;  %v4625_v56 = vcombine.low %v141_v43, %v145_v45 }
  0xb6   :  { %v440_v60 = vld [vmem:[#allocation5 + $0xaa0] sm:$0xff]  ;;  %v261_v54 = vld [vmem:[#allocation5 + $0x508] sm:$0xff] }
  0xb7   :  { %v564_v61 = vld [vmem:[#allocation5 + $0xe80] sm:$0xff]  ;;  %v4920_v2 = vcombine.high %v436_v57, %v440_v60  ;;  %3361 = vmatprep.subr.bf16.mxu1 %v5056_v62  ;;  %v4919_v8 = vcombine.low %v436_v57, %v440_v60  ;;  %v265_v55 = vld [vmem:[#allocation5 + $0x528] sm:$0xff]  ;;  %v4753_v57 = vcombine.low %v269_v46, %v273_v47  ;;  %v4618_v60 = vcombine.high %v133_v52, %v137_v53 }
  0xb8   :  { %v568_v63 = vld [vmem:[#allocation5 + $0xea0] sm:$0xff]  ;;  %3321 = vmatpush2.bf16.msra.mxu0 %v4927_v0  ;;  %3362 = vmatpush2.bf16.msra.mxu1 %v5055_v1  ;;  %v125_v62 = vld [vmem:[#allocation5 + $0xc8] sm:$0xff] }
  0xb9   :  { %v428_v3 = vld [vmem:[#allocation5 + $0xa40] sm:$0xff]  ;;  %v5048_v6 = vcombine.high %v564_v61, %v568_v63  ;;  %3322 = vmatprep.subr.bf16.mxu0 %v4920_v2  ;;  %v5047_v9 = vcombine.low %v564_v61, %v568_v63  ;;  %v4746_v61 = vcombine.high %v261_v54, %v265_v55  ;;  %v129_v63 = vld [vmem:[#allocation5 + $0xe8] sm:$0xff]  ;;  %v4617_v2 = vcombine.low %v133_v52, %v137_v53 }
  0xba   :  { %v432_v4 = vld [vmem:[#allocation5 + $0xa60] sm:$0xff]  ;;  %v253_v0 = vld [vmem:[#allocation5 + $0x4c8] sm:$0xff] }
  0xbb   :  { %v556_v5 = vld [vmem:[#allocation5 + $0xe40] sm:$0xff]  ;;  %v4912_v10 = vcombine.high %v428_v3, %v432_v4  ;;  %3363 = vmatprep.subr.bf16.mxu1 %v5048_v6  ;;  %v4911_v17 = vcombine.low %v428_v3, %v432_v4  ;;  %v257_v1 = vld [vmem:[#allocation5 + $0x4e8] sm:$0xff]  ;;  %v4745_v3 = vcombine.low %v261_v54, %v265_v55  ;;  %v4610_v4 = vcombine.high %v125_v62, %v129_v63 }
  0xbc   :  { %v560_v7 = vld [vmem:[#allocation5 + $0xe60] sm:$0xff]  ;;  %3323 = vmatpush2.bf16.msra.mxu0 %v4919_v8  ;;  %3364 = vmatpush2.bf16.msra.mxu1 %v5047_v9  ;;  %v117_v6 = vld [vmem:[#allocation5 + $0x88] sm:$0xff] }
  0xbd   :  { %v420_v11 = vld [vmem:[#allocation5 + $0xa00] sm:$0xff]  ;;  %v5040_v14 = vcombine.high %v556_v5, %v560_v7  ;;  %3324 = vmatprep.subr.bf16.mxu0 %v4912_v10  ;;  %v5039_v18 = vcombine.low %v556_v5, %v560_v7  ;;  %v4738_v5 = vcombine.high %v253_v0, %v257_v1  ;;  %v121_v7 = vld [vmem:[#allocation5 + $0xa8] sm:$0xff]  ;;  %v4609_v10 = vcombine.low %v125_v62, %v129_v63 }
  0xbe   :  { %v424_v12 = vld [vmem:[#allocation5 + $0xa20] sm:$0xff]  ;;  %v245_v8 = vld [vmem:[#allocation5 + $0x488] sm:$0xff] }
  0xbf   :  { %v548_v13 = vld [vmem:[#allocation5 + $0xe00] sm:$0xff]  ;;  %v4904_v19 = vcombine.high %v420_v11, %v424_v12  ;;  %3365 = vmatprep.subr.bf16.mxu1 %v5040_v14  ;;  %v4903_v29 = vcombine.low %v420_v11, %v424_v12  ;;  %v249_v9 = vld [vmem:[#allocation5 + $0x4a8] sm:$0xff]  ;;  %v4737_v11 = vcombine.low %v253_v0, %v257_v1  ;;  %v4602_v12 = vcombine.high %v117_v6, %v121_v7 }
  0xc0   :  { %v552_v15 = vld [vmem:[#allocation5 + $0xe20] sm:$0xff]  ;;  %3325 = vmatpush2.bf16.msra.mxu0 %v4911_v17  ;;  %3366 = vmatpush2.bf16.msra.mxu1 %v5039_v18  ;;  %v109_v14 = vld [vmem:[#allocation5 + $0x48] sm:$0xff]  ;;  %v4729_v21 = vcombine.low %v245_v8, %v249_v9 }
  0xc1   :  { %v5032_v24 = vcombine.high %v548_v13, %v552_v15  ;;  %v88_v25 = vld [vmem:[#allocation2 + $0x20] sm:$0xff]  ;;  %3326 = vmatprep.subr.bf16.mxu0 %v4904_v19  ;;  %v5031_v30 = vcombine.low %v548_v13, %v552_v15  ;;  %v4730_v13 = vcombine.high %v245_v8, %v249_v9  ;;  %v113_v15 = vld [vmem:[#allocation5 + $0x68] sm:$0xff]  ;;  %v4601_v19 = vcombine.low %v117_v6, %v121_v7 }
  0xc2   :  { %v5524_v38 = vpack.c.bf16 %v88_v25, %v88_v25  ;;  %v237_v17 = vld [vmem:[#allocation5 + $0x448] sm:$0xff]  ;;  %v4594_v22 = vcombine.high %v109_v14, %v113_v15 }
  0xc3   :  { %3367 = vmatprep.subr.bf16.mxu1 %v5032_v24  ;;  %v241_v18 = vld [vmem:[#allocation5 + $0x468] sm:$0xff] }
  0xc4   :  { %3327 = vmatpush2.bf16.msra.mxu0 %v4903_v29  ;;  %3368 = vmatpush2.bf16.msra.mxu1 %v5031_v30  ;;  %v4722_v23 = vcombine.high %v237_v17, %v241_v18  ;;  %v101_v24 = vld [vmem:[#allocation5 + $0x8] sm:$0xff]  ;;  %v4593_v29 = vcombine.low %v109_v14, %v113_v15  ;;  %v4721_v30 = vcombine.low %v237_v17, %v241_v18 }
  0xc5   :  { %3378 = vmatprep.subr.bf16.mxu0 %v4642_v32  ;;  %3419 = vmatprep.subr.bf16.mxu1 %v4770_v36  ;;  %v105_v25 = vld [vmem:[#allocation5 + $0x28] sm:$0xff] }
  0xc6   :  { %v233_v27 = vld [vmem:[#allocation5 + $0x428] sm:$0xff]  ;;  %v4586_v32 = vcombine.high %v101_v24, %v105_v25 }
  0xc7   :  { %3329 = vmatmul.mubr.bf16.vlgmr.msra.gmra.mxu0 %v5524_v38  ;;  %3370 = vmatmul.mubr.bf16.vlgmr.msra.gmra.mxu1 %v5526_v39  ;;  %v4714_v33 = vcombine.high %v229_v26, %v233_v27  ;;  %v221_v34 = vld [vmem:[#allocation5 + $0x3c8] sm:$0xff] }
  0xc8   :  { %3379 = vmatpush1.bf16.msra.mxu0 %v4641_v40  ;;  %3420 = vmatpush1.bf16.msra.mxu1 %v4769_v41  ;;  %v225_v35 = vld [vmem:[#allocation5 + $0x3e8] sm:$0xff]  ;;  %v4585_v40 = vcombine.low %v101_v24, %v105_v25  ;;  %v4713_v41 = vcombine.low %v229_v26, %v233_v27 }
  0xc9   :  { %3380 = vmatprep.subr.bf16.mxu0 %v4634_v42  ;;  %3421 = vmatprep.subr.bf16.mxu1 %v4762_v44  ;;  %v349_v36 = vld [vmem:[#allocation5 + $0x7c8] sm:$0xff]  ;;  %v4706_v42 = vcombine.high %v221_v34, %v225_v35 }
  0xca   :  { %3410 = vmatprep.mubr.bf16.mxu0 %v5506_v58  ;;  %3451 = vmatprep.mubr.bf16.mxu1 %v5508_v59  ;;  %v353_v37 = vld [vmem:[#allocation5 + $0x7e8] sm:$0xff] }
  0xcb   :  { %v4834_v43 = vcombine.high %v349_v36, %v353_v37  ;;  %v213_v44 = vld [vmem:[#allocation5 + $0x388] sm:$0xff] }
  0xcc   :  { %3381 = vmatpush1.bf16.msra.mxu0 %v4633_v48  ;;  %3422 = vmatpush1.bf16.msra.mxu1 %v4761_v49  ;;  %v217_v45 = vld [vmem:[#allocation5 + $0x3a8] sm:$0xff]  ;;  %v4705_v48 = vcombine.low %v221_v34, %v225_v35  ;;  %v4833_v49 = vcombine.low %v349_v36, %v353_v37 }
  0xcd   :  { %3382 = vmatprep.subr.bf16.mxu0 %v4626_v50  ;;  %3423 = vmatprep.subr.bf16.mxu1 %v4754_v51  ;;  %v341_v46 = vld [vmem:[#allocation5 + $0x788] sm:$0xff]  ;;  %v4698_v50 = vcombine.high %v213_v44, %v217_v45 }
  0xce   :  { %v345_v47 = vld [vmem:[#allocation5 + $0x7a8] sm:$0xff] }
  0xcf   :  { %v4826_v51 = vcombine.high %v341_v46, %v345_v47  ;;  %v205_v52 = vld [vmem:[#allocation5 + $0x348] sm:$0xff] }
  0xd0   :  { %3383 = vmatpush1.bf16.msra.mxu0 %v4625_v56  ;;  %3424 = vmatpush1.bf16.msra.mxu1 %v4753_v57  ;;  %v209_v53 = vld [vmem:[#allocation5 + $0x368] sm:$0xff]  ;;  %v4697_v56 = vcombine.low %v213_v44, %v217_v45  ;;  %v4825_v57 = vcombine.low %v341_v46, %v345_v47 }
  0xd1   :  { %3384 = vmatprep.subr.bf16.mxu0 %v4618_v60  ;;  %3425 = vmatprep.subr.bf16.mxu1 %v4746_v61  ;;  %v333_v54 = vld [vmem:[#allocation5 + $0x748] sm:$0xff]  ;;  %v4690_v60 = vcombine.high %v205_v52, %v209_v53 }
  0xd2   :  { %v337_v55 = vld [vmem:[#allocation5 + $0x768] sm:$0xff] }
  0xd3   :  { %v4818_v61 = vcombine.high %v333_v54, %v337_v55  ;;  %v197_v62 = vld [vmem:[#allocation5 + $0x308] sm:$0xff] }
  0xd4   :  { %3385 = vmatpush1.bf16.msra.mxu0 %v4617_v2  ;;  %3426 = vmatpush1.bf16.msra.mxu1 %v4745_v3  ;;  %v201_v63 = vld [vmem:[#allocation5 + $0x328] sm:$0xff]  ;;  %v4689_v2 = vcombine.low %v205_v52, %v209_v53  ;;  %v4817_v3 = vcombine.low %v333_v54, %v337_v55 }
  0xd5   :  { %3386 = vmatprep.subr.bf16.mxu0 %v4610_v4  ;;  %3427 = vmatprep.subr.bf16.mxu1 %v4738_v5  ;;  %v325_v0 = vld [vmem:[#allocation5 + $0x708] sm:$0xff]  ;;  %v4682_v4 = vcombine.high %v197_v62, %v201_v63 }
  0xd6   :  { %v329_v1 = vld [vmem:[#allocation5 + $0x728] sm:$0xff] }
  0xd7   :  { %v4810_v5 = vcombine.high %v325_v0, %v329_v1  ;;  %v189_v6 = vld [vmem:[#allocation5 + $0x2c8] sm:$0xff] }
  0xd8   :  { %3387 = vmatpush1.bf16.msra.mxu0 %v4609_v10  ;;  %3428 = vmatpush1.bf16.msra.mxu1 %v4737_v11  ;;  %v193_v7 = vld [vmem:[#allocation5 + $0x2e8] sm:$0xff]  ;;  %v4681_v10 = vcombine.low %v197_v62, %v201_v63  ;;  %v4809_v11 = vcombine.low %v325_v0, %v329_v1 }
  0xd9   :  { %3388 = vmatprep.subr.bf16.mxu0 %v4602_v12  ;;  %3429 = vmatprep.subr.bf16.mxu1 %v4730_v13  ;;  %v317_v8 = vld [vmem:[#allocation5 + $0x6c8] sm:$0xff]  ;;  %v4674_v12 = vcombine.high %v189_v6, %v193_v7 }
  0xda   :  { %v321_v9 = vld [vmem:[#allocation5 + $0x6e8] sm:$0xff] }
  0xdb   :  { %v4802_v13 = vcombine.high %v317_v8, %v321_v9  ;;  %v181_v14 = vld [vmem:[#allocation5 + $0x288] sm:$0xff] }
  0xdc   :  { %3389 = vmatpush1.bf16.msra.mxu0 %v4601_v19  ;;  %3430 = vmatpush1.bf16.msra.mxu1 %v4729_v21  ;;  %v185_v15 = vld [vmem:[#allocation5 + $0x2a8] sm:$0xff]  ;;  %v4673_v19 = vcombine.low %v189_v6, %v193_v7  ;;  %v4801_v21 = vcombine.low %v317_v8, %v321_v9 }
  0xdd   :  { %3390 = vmatprep.subr.bf16.mxu0 %v4594_v22  ;;  %3431 = vmatprep.subr.bf16.mxu1 %v4722_v23  ;;  %v309_v17 = vld [vmem:[#allocation5 + $0x688] sm:$0xff]  ;;  %v4666_v22 = vcombine.high %v181_v14, %v185_v15 }
  0xde   :  { %v313_v18 = vld [vmem:[#allocation5 + $0x6a8] sm:$0xff] }
  0xdf   :  { %v4794_v23 = vcombine.high %v309_v17, %v313_v18  ;;  %v173_v24 = vld [vmem:[#allocation5 + $0x248] sm:$0xff] }
  0xe0   :  { %3391 = vmatpush1.bf16.msra.mxu0 %v4593_v29  ;;  %3432 = vmatpush1.bf16.msra.mxu1 %v4721_v30  ;;  %v177_v25 = vld [vmem:[#allocation5 + $0x268] sm:$0xff]  ;;  %v4665_v29 = vcombine.low %v181_v14, %v185_v15  ;;  %v4793_v30 = vcombine.low %v309_v17, %v313_v18 }
  0xe1   :  { %3392 = vmatprep.subr.bf16.mxu0 %v4586_v32  ;;  %3433 = vmatprep.subr.bf16.mxu1 %v4714_v33  ;;  %v301_v26 = vld [vmem:[#allocation5 + $0x648] sm:$0xff]  ;;  %v4658_v32 = vcombine.high %v173_v24, %v177_v25 }
  0xe2   :  { %v305_v27 = vld [vmem:[#allocation5 + $0x668] sm:$0xff] }
  0xe3   :  { %v4786_v33 = vcombine.high %v301_v26, %v305_v27  ;;  %v165_v34 = vld [vmem:[#allocation5 + $0x208] sm:$0xff] }
  0xe4   :  { %3393 = vmatpush1.bf16.msra.mxu0 %v4585_v40  ;;  %3434 = vmatpush1.bf16.msra.mxu1 %v4713_v41  ;;  %v169_v35 = vld [vmem:[#allocation5 + $0x228] sm:$0xff]  ;;  %v4657_v40 = vcombine.low %v173_v24, %v177_v25  ;;  %v4785_v41 = vcombine.low %v301_v26, %v305_v27 }
  0xe5   :  { %3394 = vmatprep.subr.bf16.mxu0 %v4706_v42  ;;  %3435 = vmatprep.subr.bf16.mxu1 %v4834_v43  ;;  %v293_v36 = vld [vmem:[#allocation5 + $0x608] sm:$0xff]  ;;  %v4650_v42 = vcombine.high %v165_v34, %v169_v35 }
  0xe6   :  { %v297_v37 = vld [vmem:[#allocation5 + $0x628] sm:$0xff] }
  0xe7   :  { %v4778_v43 = vcombine.high %v293_v36, %v297_v37  ;;  %v413_v44 = vld [vmem:[#allocation5 + $0x9c8] sm:$0xff] }
  0xe8   :  { %3395 = vmatpush2.bf16.msra.mxu0 %v4705_v48  ;;  %3436 = vmatpush2.bf16.msra.mxu1 %v4833_v49  ;;  %v417_v45 = vld [vmem:[#allocation5 + $0x9e8] sm:$0xff]  ;;  %v4649_v48 = vcombine.low %v165_v34, %v169_v35  ;;  %v4777_v49 = vcombine.low %v293_v36, %v297_v37 }
  0xe9   :  { %3396 = vmatprep.subr.bf16.mxu0 %v4698_v50  ;;  %3437 = vmatprep.subr.bf16.mxu1 %v4826_v51  ;;  %v541_v46 = vld [vmem:[#allocation5 + $0xdc8] sm:$0xff]  ;;  %v4898_v50 = vcombine.high %v413_v44, %v417_v45 }
  0xea   :  { %v545_v47 = vld [vmem:[#allocation5 + $0xde8] sm:$0xff] }
  0xeb   :  { %v5026_v51 = vcombine.high %v541_v46, %v545_v47  ;;  %v405_v52 = vld [vmem:[#allocation5 + $0x988] sm:$0xff] }
  0xec   :  { %3397 = vmatpush2.bf16.msra.mxu0 %v4697_v56  ;;  %3438 = vmatpush2.bf16.msra.mxu1 %v4825_v57  ;;  %v409_v53 = vld [vmem:[#allocation5 + $0x9a8] sm:$0xff]  ;;  %v4897_v56 = vcombine.low %v413_v44, %v417_v45  ;;  %v5025_v57 = vcombine.low %v541_v46, %v545_v47 }
  0xed   :  { %3398 = vmatprep.subr.bf16.mxu0 %v4690_v60  ;;  %3439 = vmatprep.subr.bf16.mxu1 %v4818_v61  ;;  %v533_v54 = vld [vmem:[#allocation5 + $0xd88] sm:$0xff]  ;;  %v4890_v60 = vcombine.high %v405_v52, %v409_v53 }
  0xee   :  { %v537_v55 = vld [vmem:[#allocation5 + $0xda8] sm:$0xff] }
  0xef   :  { %v5018_v61 = vcombine.high %v533_v54, %v537_v55  ;;  %v397_v62 = vld [vmem:[#allocation5 + $0x948] sm:$0xff] }
  0xf0   :  { %3399 = vmatpush2.bf16.msra.mxu0 %v4689_v2  ;;  %3440 = vmatpush2.bf16.msra.mxu1 %v4817_v3  ;;  %v401_v63 = vld [vmem:[#allocation5 + $0x968] sm:$0xff]  ;;  %v4889_v2 = vcombine.low %v405_v52, %v409_v53  ;;  %v5017_v3 = vcombine.low %v533_v54, %v537_v55 }
  0xf1   :  { %3400 = vmatprep.subr.bf16.mxu0 %v4682_v4  ;;  %3441 = vmatprep.subr.bf16.mxu1 %v4810_v5  ;;  %v525_v0 = vld [vmem:[#allocation5 + $0xd48] sm:$0xff]  ;;  %v4882_v4 = vcombine.high %v397_v62, %v401_v63 }
  0xf2   :  { %v529_v1 = vld [vmem:[#allocation5 + $0xd68] sm:$0xff] }
  0xf3   :  { %v5010_v5 = vcombine.high %v525_v0, %v529_v1  ;;  %v389_v6 = vld [vmem:[#allocation5 + $0x908] sm:$0xff] }
  0xf4   :  { %3401 = vmatpush2.bf16.msra.mxu0 %v4681_v10  ;;  %3442 = vmatpush2.bf16.msra.mxu1 %v4809_v11  ;;  %v393_v7 = vld [vmem:[#allocation5 + $0x928] sm:$0xff]  ;;  %v4881_v10 = vcombine.low %v397_v62, %v401_v63  ;;  %v5009_v11 = vcombine.low %v525_v0, %v529_v1 }
  0xf5   :  { %3402 = vmatprep.subr.bf16.mxu0 %v4674_v12  ;;  %3443 = vmatprep.subr.bf16.mxu1 %v4802_v13  ;;  %v517_v8 = vld [vmem:[#allocation5 + $0xd08] sm:$0xff]  ;;  %v4874_v12 = vcombine.high %v389_v6, %v393_v7 }
  0xf6   :  { %v521_v9 = vld [vmem:[#allocation5 + $0xd28] sm:$0xff] }
  0xf7   :  { %v5002_v13 = vcombine.high %v517_v8, %v521_v9  ;;  %v381_v14 = vld [vmem:[#allocation5 + $0x8c8] sm:$0xff] }
  0xf8   :  { %3403 = vmatpush2.bf16.msra.mxu0 %v4673_v19  ;;  %3444 = vmatpush2.bf16.msra.mxu1 %v4801_v21  ;;  %v385_v15 = vld [vmem:[#allocation5 + $0x8e8] sm:$0xff]  ;;  %v4873_v19 = vcombine.low %v389_v6, %v393_v7  ;;  %v5001_v21 = vcombine.low %v517_v8, %v521_v9 }
  0xf9   :  { %3404 = vmatprep.subr.bf16.mxu0 %v4666_v22  ;;  %3445 = vmatprep.subr.bf16.mxu1 %v4794_v23  ;;  %v509_v17 = vld [vmem:[#allocation5 + $0xcc8] sm:$0xff]  ;;  %v4866_v22 = vcombine.high %v381_v14, %v385_v15 }
  0xfa   :  { %v513_v18 = vld [vmem:[#allocation5 + $0xce8] sm:$0xff] }
  0xfb   :  { %v4994_v23 = vcombine.high %v509_v17, %v513_v18  ;;  %v373_v24 = vld [vmem:[#allocation5 + $0x888] sm:$0xff] }
  0xfc   :  { %3405 = vmatpush2.bf16.msra.mxu0 %v4665_v29  ;;  %3446 = vmatpush2.bf16.msra.mxu1 %v4793_v30  ;;  %v377_v25 = vld [vmem:[#allocation5 + $0x8a8] sm:$0xff]  ;;  %v4865_v29 = vcombine.low %v381_v14, %v385_v15  ;;  %v4993_v30 = vcombine.low %v509_v17, %v513_v18 }
  0xfd   :  { %3406 = vmatprep.subr.bf16.mxu0 %v4658_v32  ;;  %3447 = vmatprep.subr.bf16.mxu1 %v4786_v33  ;;  %v501_v26 = vld [vmem:[#allocation5 + $0xc88] sm:$0xff]  ;;  %v4858_v32 = vcombine.high %v373_v24, %v377_v25 }
  0xfe   :  { %v505_v27 = vld [vmem:[#allocation5 + $0xca8] sm:$0xff] }
  0xff   :  { %v4986_v33 = vcombine.high %v501_v26, %v505_v27  ;;  %v365_v34 = vld [vmem:[#allocation5 + $0x848] sm:$0xff] }
 0x100   :  { %3407 = vmatpush2.bf16.msra.mxu0 %v4657_v40  ;;  %3448 = vmatpush2.bf16.msra.mxu1 %v4785_v41  ;;  %v369_v35 = vld [vmem:[#allocation5 + $0x868] sm:$0xff]  ;;  %v4857_v40 = vcombine.low %v373_v24, %v377_v25  ;;  %v4985_v41 = vcombine.low %v501_v26, %v505_v27 }
 0x101   :  { %3408 = vmatprep.subr.bf16.mxu0 %v4650_v42  ;;  %3449 = vmatprep.subr.bf16.mxu1 %v4778_v43  ;;  %v493_v36 = vld [vmem:[#allocation5 + $0xc48] sm:$0xff]  ;;  %v4850_v42 = vcombine.high %v365_v34, %v369_v35 }
 0x102   :  { %v497_v37 = vld [vmem:[#allocation5 + $0xc68] sm:$0xff] }
 0x103   :  { %v4978_v43 = vcombine.high %v493_v36, %v497_v37  ;;  %v357_v44 = vld [vmem:[#allocation5 + $0x808] sm:$0xff] }
 0x104   :  { %3409 = vmatpush2.bf16.msra.mxu0 %v4649_v48  ;;  %3450 = vmatpush2.bf16.msra.mxu1 %v4777_v49  ;;  %v361_v45 = vld [vmem:[#allocation5 + $0x828] sm:$0xff]  ;;  %v4849_v48 = vcombine.low %v365_v34, %v369_v35  ;;  %v4977_v49 = vcombine.low %v493_v36, %v497_v37 }
 0x105   :  { %3460 = vmatprep.subr.bf16.mxu0 %v4898_v50  ;;  %3501 = vmatprep.subr.bf16.mxu1 %v5026_v51  ;;  %v485_v46 = vld [vmem:[#allocation5 + $0xc08] sm:$0xff]  ;;  %v4842_v50 = vcombine.high %v357_v44, %v361_v45 }
 0x106   :  { %v489_v47 = vld [vmem:[#allocation5 + $0xc28] sm:$0xff] }
 0x107   :  { %3411 = vmatmul.mubr.bf16.vlgmr.msra.gmra.mxu0 %v5512_v16  ;;  %3452 = vmatmul.mubr.bf16.vlgmr.msra.gmra.mxu1 %v5514_v20  ;;  %v4970_v51 = vcombine.high %v485_v46, %v489_v47  ;;  %v477_v52 = vld [vmem:[#allocation5 + $0xbc8] sm:$0xff] }
 0x108   :  { %3461 = vmatpush1.bf16.msra.mxu0 %v4897_v56  ;;  %3502 = vmatpush1.bf16.msra.mxu1 %v5025_v57  ;;  %v481_v53 = vld [vmem:[#allocation5 + $0xbe8] sm:$0xff]  ;;  %v4841_v56 = vcombine.low %v357_v44, %v361_v45  ;;  %v4969_v57 = vcombine.low %v485_v46, %v489_v47 }
 0x109   :  { %3462 = vmatprep.subr.bf16.mxu0 %v4890_v60  ;;  %3503 = vmatprep.subr.bf16.mxu1 %v5018_v61  ;;  %v605_v54 = vld [vmem:[#allocation5 + $0xfc8] sm:$0xff]  ;;  %v4962_v60 = vcombine.high %v477_v52, %v481_v53 }
 0x10a   :  { %3492 = vmatprep.mubr.bf16.mxu0 %v5516_v28  ;;  %3533 = vmatprep.mubr.bf16.mxu1 %v5519_v31  ;;  %v609_v55 = vld [vmem:[#allocation5 + $0xfe8] sm:$0xff] }
 0x10b   :  { %v5090_v61 = vcombine.high %v605_v54, %v609_v55  ;;  %v469_v62 = vld [vmem:[#allocation5 + $0xb88] sm:$0xff] }
 0x10c   :  { %3463 = vmatpush1.bf16.msra.mxu0 %v4889_v2  ;;  %3504 = vmatpush1.bf16.msra.mxu1 %v5017_v3  ;;  %v473_v63 = vld [vmem:[#allocation5 + $0xba8] sm:$0xff]  ;;  %v4961_v2 = vcombine.low %v477_v52, %v481_v53  ;;  %v5089_v3 = vcombine.low %v605_v54, %v609_v55 }
 0x10d   :  { %3464 = vmatprep.subr.bf16.mxu0 %v4882_v4  ;;  %3505 = vmatprep.subr.bf16.mxu1 %v5010_v5  ;;  %v597_v0 = vld [vmem:[#allocation5 + $0xf88] sm:$0xff]  ;;  %v4954_v4 = vcombine.high %v469_v62, %v473_v63 }
 0x10e   :  { %v601_v1 = vld [vmem:[#allocation5 + $0xfa8] sm:$0xff] }
 0x10f   :  { %v5082_v5 = vcombine.high %v597_v0, %v601_v1  ;;  %v461_v6 = vld [vmem:[#allocation5 + $0xb48] sm:$0xff] }
 0x110   :  { %3465 = vmatpush1.bf16.msra.mxu0 %v4881_v10  ;;  %3506 = vmatpush1.bf16.msra.mxu1 %v5009_v11  ;;  %v465_v7 = vld [vmem:[#allocation5 + $0xb68] sm:$0xff]  ;;  %v4953_v10 = vcombine.low %v469_v62, %v473_v63  ;;  %v5081_v11 = vcombine.low %v597_v0, %v601_v1  ;;  %v158_v0 = vld [vmem:[#allocation5 + $0x1d0] sm:$0xff] }
 0x111   :  { %3466 = vmatprep.subr.bf16.mxu0 %v4874_v12  ;;  %3507 = vmatprep.subr.bf16.mxu1 %v5002_v13  ;;  %v589_v8 = vld [vmem:[#allocation5 + $0xf48] sm:$0xff]  ;;  %v4946_v12 = vcombine.high %v461_v6, %v465_v7  ;;  %v162_v1 = vld [vmem:[#allocation5 + $0x1f0] sm:$0xff] }
 0x112   :  { %v593_v9 = vld [vmem:[#allocation5 + $0xf68] sm:$0xff] }
 0x113   :  { %v5074_v13 = vcombine.high %v589_v8, %v593_v9  ;;  %v453_v14 = vld [vmem:[#allocation5 + $0xb08] sm:$0xff] }
 0x114   :  { %3467 = vmatpush1.bf16.msra.mxu0 %v4873_v19  ;;  %3508 = vmatpush1.bf16.msra.mxu1 %v5001_v21  ;;  %v457_v15 = vld [vmem:[#allocation5 + $0xb28] sm:$0xff]  ;;  %v4945_v19 = vcombine.low %v461_v6, %v465_v7  ;;  %v5073_v21 = vcombine.low %v589_v8, %v593_v9  ;;  %v5539_v7 = vld [vmem:[#allocation7] sm:$0xff]  ;;  %v4644_v8 = vcombine.high %v158_v0, %v162_v1 }
 0x115   :  { %3468 = vmatprep.subr.bf16.mxu0 %v4866_v22  ;;  %3509 = vmatprep.subr.bf16.mxu1 %v4994_v23  ;;  %v581_v17 = vld [vmem:[#allocation5 + $0xf08] sm:$0xff]  ;;  %v4938_v22 = vcombine.high %v453_v14, %v457_v15 }
 0x116   :  { %v585_v18 = vld [vmem:[#allocation5 + $0xf28] sm:$0xff] }
 0x117   :  { %v5066_v23 = vcombine.high %v581_v17, %v585_v18  ;;  %v445_v24 = vld [vmem:[#allocation5 + $0xac8] sm:$0xff] }
 0x118   :  { %3469 = vmatpush1.bf16.msra.mxu0 %v4865_v29  ;;  %3510 = vmatpush1.bf16.msra.mxu1 %v4993_v30  ;;  %v449_v25 = vld [vmem:[#allocation5 + $0xae8] sm:$0xff]  ;;  %v4937_v29 = vcombine.low %v453_v14, %v457_v15  ;;  %v5065_v30 = vcombine.low %v581_v17, %v585_v18  ;;  %v282_v14 = vld [vmem:[#allocation5 + $0x5b0] sm:$0xff]  ;;  %v4643_v17 = vcombine.low %v158_v0, %v162_v1 }
 0x119   :  { %3470 = vmatprep.subr.bf16.mxu0 %v4858_v32  ;;  %3511 = vmatprep.subr.bf16.mxu1 %v4986_v33  ;;  %v573_v26 = vld [vmem:[#allocation5 + $0xec8] sm:$0xff]  ;;  %v4930_v32 = vcombine.high %v445_v24, %v449_v25 }
 0x11a   :  { %v577_v27 = vld [vmem:[#allocation5 + $0xee8] sm:$0xff] }
 0x11b   :  { %v5058_v33 = vcombine.high %v573_v26, %v577_v27  ;;  %v437_v34 = vld [vmem:[#allocation5 + $0xa88] sm:$0xff] }
 0x11c   :  { %3471 = vmatpush1.bf16.msra.mxu0 %v4857_v40  ;;  %3512 = vmatpush1.bf16.msra.mxu1 %v4985_v41  ;;  %v441_v35 = vld [vmem:[#allocation5 + $0xaa8] sm:$0xff]  ;;  %v4929_v40 = vcombine.low %v445_v24, %v449_v25  ;;  %v5057_v41 = vcombine.low %v573_v26, %v577_v27  ;;  %v146_v24 = vld [vmem:[#allocation5 + $0x170] sm:$0xff] }
 0x11d   :  { %3472 = vmatprep.subr.bf16.mxu0 %v4850_v42  ;;  %3513 = vmatprep.subr.bf16.mxu1 %v4978_v43  ;;  %v565_v36 = vld [vmem:[#allocation5 + $0xe88] sm:$0xff]  ;;  %v4922_v42 = vcombine.high %v437_v34, %v441_v35  ;;  %v270_v26 = vld [vmem:[#allocation5 + $0x550] sm:$0xff] }
 0x11e   :  { %v569_v37 = vld [vmem:[#allocation5 + $0xea8] sm:$0xff]  ;;  %v274_v27 = vld [vmem:[#allocation5 + $0x570] sm:$0xff] }
 0x11f   :  { %v5050_v43 = vcombine.high %v565_v36, %v569_v37  ;;  %v429_v44 = vld [vmem:[#allocation5 + $0xa48] sm:$0xff] }
 0x120   :  { %3473 = vmatpush1.bf16.msra.mxu0 %v4849_v48  ;;  %3514 = vmatpush1.bf16.msra.mxu1 %v4977_v49  ;;  %v433_v45 = vld [vmem:[#allocation5 + $0xa68] sm:$0xff]  ;;  %v4921_v48 = vcombine.low %v437_v34, %v441_v35  ;;  %v614_v49 = vlaneseq }
 0x121   :  { %3474 = vmatprep.subr.bf16.mxu0 %v4842_v50  ;;  %3515 = vmatprep.subr.bf16.mxu1 %v4970_v51  ;;  %v557_v46 = vld [vmem:[#allocation5 + $0xe48] sm:$0xff]  ;;  %v5049_v50 = vcombine.low %v565_v36, %v569_v37  ;;  %v4914_v51 = vcombine.high %v429_v44, %v433_v45 }
 0x122   :  { %v561_v47 = vld [vmem:[#allocation5 + $0xe68] sm:$0xff] }
 0x123   :  { %v5042_v52 = vcombine.high %v557_v46, %v561_v47  ;;  %v421_v53 = vld [vmem:[#allocation5 + $0xa08] sm:$0xff] }
 0x124   :  { %3475 = vmatpush1.bf16.msra.mxu0 %v4841_v56  ;;  %3516 = vmatpush1.bf16.msra.mxu1 %v4969_v57  ;;  %v425_v54 = vld [vmem:[#allocation5 + $0xa28] sm:$0xff]  ;;  %v4913_v57 = vcombine.low %v429_v44, %v433_v45  ;;  %v262_v45 = vld [vmem:[#allocation5 + $0x510] sm:$0xff] }
 0x125   :  { %3476 = vmatprep.subr.bf16.mxu0 %v4962_v60  ;;  %3517 = vmatprep.subr.bf16.mxu1 %v5090_v61  ;;  %v549_v55 = vld [vmem:[#allocation5 + $0xe08] sm:$0xff]  ;;  %v5536_v60 = vshrl.u32 %v614_v49, 7  ;;  %v5041_v61 = vcombine.low %v557_v46, %v561_v47  ;;  %v4906_v62 = vcombine.high %v421_v53, %v425_v54  ;;  %v266_v46 = vld [vmem:[#allocation5 + $0x530] sm:$0xff] }
 0x126   :  { %v553_v56 = vld [vmem:[#allocation5 + $0xe28] sm:$0xff] }
 0x127   :  { %v5034_v63 = vcombine.high %v549_v55, %v553_v56  ;;  %v5033_v6 = vcombine.low %v549_v55, %v553_v56  ;;  %v126_v55 = vld [vmem:[#allocation5 + $0xd0] sm:$0xff] }
 0x128   :  { %3477 = vmatpush2.bf16.msra.mxu0 %v4961_v2  ;;  %3518 = vmatpush2.bf16.msra.mxu1 %v5089_v3  ;;  %v286_v2 = vld [vmem:[#allocation5 + $0x5d0] sm:$0xff] }
 0x129   :  { %3478 = vmatprep.subr.bf16.mxu0 %v4954_v4  ;;  %3519 = vmatprep.subr.bf16.mxu1 %v5082_v5  ;;  %v290_v3 = vld [vmem:[#allocation5 + $0x5f0] sm:$0xff]  ;;  %v4905_v4 = vcombine.low %v421_v53, %v425_v54  ;;  %v616_v5 = vsub.s32 0, %v5536_v60  ;;  %v4748_v54 = vcombine.high %v262_v45, %v266_v46 }
 0x12a   :  { %v4772_v9 = vcombine.high %v286_v2, %v290_v3  ;;  %v4771_v18 = vcombine.low %v286_v2, %v290_v3  ;;  %v130_v56 = vld [vmem:[#allocation5 + $0xf0] sm:$0xff] }
 0x12b   :  { %v617_v15 = vrot.slane %v5539_v7, %v616_v5  ;;  %v4612_v0 = vcombine.high %v126_v55, %v130_v56  ;;  %v118_v2 = vld [vmem:[#allocation5 + $0x90] sm:$0xff] }
 0x12c   :  { %3479 = vmatpush2.bf16.msra.mxu0 %v4953_v10  ;;  %3520 = vmatpush2.bf16.msra.mxu1 %v5081_v11  ;;  %v620_v10 = vsub.s32 1, %v5536_v60  ;;  %v150_v11 = vld [vmem:[#allocation5 + $0x190] sm:$0xff] }
 0x12d   :  { %3480 = vmatprep.subr.bf16.mxu0 %v4946_v12  ;;  %3521 = vmatprep.subr.bf16.mxu1 %v5074_v13  ;;  %v154_v12 = vld [vmem:[#allocation5 + $0x1b0] sm:$0xff] }
 0x12e   :  { %v278_v13 = vld [vmem:[#allocation5 + $0x590] sm:$0xff] }
 0x12f   :  { %v4763_v34 = vcombine.low %v278_v13, %v282_v14  ;;  %v122_v3 = vld [vmem:[#allocation5 + $0xb0] sm:$0xff] }
 0x130   :  { %3481 = vmatpush2.bf16.msra.mxu0 %v4945_v19  ;;  %3522 = vmatpush2.bf16.msra.mxu1 %v5073_v21  ;;  %v4636_v19 = vcombine.high %v150_v11, %v154_v12  ;;  %v621_v21 = vrot.slane %v5539_v7, %v620_v10  ;;  %v250_v5 = vld [vmem:[#allocation5 + $0x4b0] sm:$0xff] }
 0x131   :  { %3482 = vmatprep.subr.bf16.mxu0 %v4938_v22  ;;  %3523 = vmatprep.subr.bf16.mxu1 %v5066_v23  ;;  %v4764_v22 = vcombine.high %v278_v13, %v282_v14  ;;  %v142_v23 = vld [vmem:[#allocation5 + $0x150] sm:$0xff] }
 0x132   :  { %v4628_v35 = vcombine.high %v142_v23, %v146_v24  ;;  %v4627_v49 = vcombine.low %v142_v23, %v146_v24  ;;  %v238_v13 = vld [vmem:[#allocation5 + $0x450] sm:$0xff] }
 0x133   :  { %v242_v14 = vld [vmem:[#allocation5 + $0x470] sm:$0xff] }
 0x134   :  { %3483 = vmatpush2.bf16.msra.mxu0 %v4937_v29  ;;  %3524 = vmatpush2.bf16.msra.mxu1 %v5065_v30  ;;  %v230_v23 = vld [vmem:[#allocation5 + $0x410] sm:$0xff] }
 0x135   :  { %3484 = vmatprep.subr.bf16.mxu0 %v4930_v32  ;;  %3525 = vmatprep.subr.bf16.mxu1 %v5058_v33  ;;  %v4635_v32 = vcombine.low %v150_v11, %v154_v12  ;;  %v110_v11 = vld [vmem:[#allocation5 + $0x50] sm:$0xff] }
 0x136   :  { %v114_v12 = vld [vmem:[#allocation5 + $0x70] sm:$0xff] }
 0x137   :  { %v234_v24 = vld [vmem:[#allocation5 + $0x430] sm:$0xff] }
 0x138   :  { %3485 = vmatpush2.bf16.msra.mxu0 %v4929_v40  ;;  %3526 = vmatpush2.bf16.msra.mxu1 %v5057_v41  ;;  %v4756_v41 = vcombine.high %v270_v26, %v274_v27 }
 0x139   :  { %3486 = vmatprep.subr.bf16.mxu0 %v4922_v42  ;;  %3527 = vmatprep.subr.bf16.mxu1 %v5050_v43  ;;  %v134_v42 = vld [vmem:[#allocation5 + $0x110] sm:$0xff] }
 0x13a   :  { %v138_v43 = vld [vmem:[#allocation5 + $0x130] sm:$0xff] }
 0x13c   :  { %3487 = vmatpush2.bf16.msra.mxu0 %v4921_v48  ;;  %3528 = vmatpush2.bf16.msra.mxu1 %v5049_v50 }
 0x13d   :  { %3488 = vmatprep.subr.bf16.mxu0 %v4914_v51  ;;  %3529 = vmatprep.subr.bf16.mxu1 %v5042_v52  ;;  %v4755_v51 = vcombine.low %v270_v26, %v274_v27  ;;  %v4620_v52 = vcombine.high %v134_v42, %v138_v43  ;;  %v4723_v26 = vcombine.low %v238_v13, %v242_v14 }
 0x140   :  { %3489 = vmatpush2.bf16.msra.mxu0 %v4913_v57  ;;  %3530 = vmatpush2.bf16.msra.mxu1 %v5041_v61  ;;  %v254_v57 = vld [vmem:[#allocation5 + $0x4d0] sm:$0xff] }
 0x141   :  { %3490 = vmatprep.subr.bf16.mxu0 %v4906_v62  ;;  %3531 = vmatprep.subr.bf16.mxu1 %v5034_v63  ;;  %v258_v61 = vld [vmem:[#allocation5 + $0x4f0] sm:$0xff]  ;;  %v4619_v62 = vcombine.low %v134_v42, %v138_v43  ;;  %v4747_v63 = vcombine.low %v262_v45, %v266_v46 }
 0x142   :  { %v4740_v1 = vcombine.high %v254_v57, %v258_v61  ;;  %v214_v42 = vld [vmem:[#allocation5 + $0x390] sm:$0xff] }
 0x143   :  { %v218_v43 = vld [vmem:[#allocation5 + $0x3b0] sm:$0xff] }
 0x144   :  { %3491 = vmatpush2.bf16.msra.mxu0 %v4905_v4  ;;  %3532 = vmatpush2.bf16.msra.mxu1 %v5033_v6  ;;  %v246_v4 = vld [vmem:[#allocation5 + $0x490] sm:$0xff]  ;;  %v4611_v6 = vcombine.low %v126_v55, %v130_v56  ;;  %v4699_v55 = vcombine.low %v214_v42, %v218_v43 }
 0x145   :  { %3542 = vmatprep.subr.bf16.mxu0 %v4644_v8  ;;  %3583 = vmatprep.subr.bf16.mxu1 %v4772_v9  ;;  %v4739_v8 = vcombine.low %v254_v57, %v258_v61  ;;  %v4604_v9 = vcombine.high %v118_v2, %v122_v3  ;;  %v4732_v10 = vcombine.high %v246_v4, %v250_v5  ;;  %v346_v45 = vld [vmem:[#allocation5 + $0x7b0] sm:$0xff] }
 0x146   :  { %v3289_v30 = vpop.f32.mrf.mxu1 }
 0x147   :  { %v3248_v25 = vpop.f32.mrf.mxu0  ;;  %3493 = vmatmul.mubr.bf16.vlgmr.msra.gmra.mxu0 %v5524_v38  ;;  %3534 = vmatmul.mubr.bf16.vlgmr.msra.gmra.mxu1 %v5526_v39 }
 0x148   :  { %v3249_v29 = vadd.f32 %v3248_v25, %v617_v15  ;;  %3543 = vmatpush1.bf16.msra.mxu0 %v4643_v17  ;;  %3584 = vmatpush1.bf16.msra.mxu1 %v4771_v18  ;;  %v3291_v40 = vpop.f32.mrf.mxu1  ;;  %v4603_v15 = vcombine.low %v118_v2, %v122_v3  ;;  %v4731_v17 = vcombine.low %v246_v4, %v250_v5 }
 0x149   :  { %v3250_v33 = vpop.f32.mrf.mxu0  ;;  %3544 = vmatprep.subr.bf16.mxu0 %v4636_v19  ;;  %3585 = vmatprep.subr.bf16.mxu1 %v4764_v22  ;;  %v4596_v18 = vcombine.high %v110_v11, %v114_v12  ;;  %v4724_v19 = vcombine.high %v238_v13, %v242_v14  ;;  %v106_v22 = vld [vmem:[#allocation5 + $0x30] sm:$0xff]  ;;  %v4595_v25 = vcombine.low %v110_v11, %v114_v12 }
 0x14a   :  { %v5546_v36 = vadd.f32 %v3289_v30, %v3249_v29  ;;  %v3251_v37 = vadd.f32 %v3250_v33, %v621_v21  ;;  %3574 = vmatprep.mubr.bf16.mxu0 %v5506_v58  ;;  %3615 = vmatprep.mubr.bf16.mxu1 %v5508_v59  ;;  %v3293_v48 = vpop.f32.mrf.mxu1  ;;  %v102_v21 = vld [vmem:[#allocation5 + $0x10] sm:$0xff]  ;;  %v4716_v29 = vcombine.high %v230_v23, %v234_v24 }
 0x14b   :  { %v3252_v44 = vpop.f32.mrf.mxu0  ;;  %v4588_v27 = vcombine.high %v102_v21, %v106_v22  ;;  %v222_v30 = vld [vmem:[#allocation5 + $0x3d0] sm:$0xff] }
 0x14c   :  { %v5550_v47 = vadd.f32 %v3291_v40, %v3251_v37  ;;  %3545 = vmatpush1.bf16.msra.mxu0 %v4635_v32  ;;  %3586 = vmatpush1.bf16.msra.mxu1 %v4763_v34  ;;  %v3294_v53 = vpop.f32.mrf.mxu1  ;;  %v226_v32 = vld [vmem:[#allocation5 + $0x3f0] sm:$0xff]  ;;  %v4715_v37 = vcombine.low %v230_v23, %v234_v24 }
 0x14d   :  { %v3253_v50 = vpop.f32.mrf.mxu0  ;;  %3546 = vmatprep.subr.bf16.mxu0 %v4628_v35  ;;  %3587 = vmatprep.subr.bf16.mxu1 %v4756_v41  ;;  %v350_v33 = vld [vmem:[#allocation5 + $0x7d0] sm:$0xff]  ;;  %v4587_v35 = vcombine.low %v102_v21, %v106_v22  ;;  %v4708_v40 = vcombine.high %v222_v30, %v226_v32  ;;  %v4707_v46 = vcombine.low %v222_v30, %v226_v32 }
 0x14e   :  { %v354_v34 = vld [vmem:[#allocation5 + $0x7f0] sm:$0xff] }
 0x14f   :  { %v4836_v41 = vcombine.high %v350_v33, %v354_v34  ;;  %v342_v44 = vld [vmem:[#allocation5 + $0x790] sm:$0xff]  ;;  %v4835_v48 = vcombine.low %v350_v33, %v354_v34 }
 0x150   :  { %3547 = vmatpush1.bf16.msra.mxu0 %v4627_v49  ;;  %3588 = vmatpush1.bf16.msra.mxu1 %v4755_v51  ;;  %v4700_v49 = vcombine.high %v214_v42, %v218_v43  ;;  %v4828_v50 = vcombine.high %v342_v44, %v346_v45  ;;  %v206_v51 = vld [vmem:[#allocation5 + $0x350] sm:$0xff]  ;;  %v4827_v56 = vcombine.low %v342_v44, %v346_v45 }
 0x151   :  { %3548 = vmatprep.subr.bf16.mxu0 %v4620_v52  ;;  %3589 = vmatprep.subr.bf16.mxu1 %v4748_v54  ;;  %v210_v52 = vld [vmem:[#allocation5 + $0x370] sm:$0xff] }
 0x152   :  { %v334_v53 = vld [vmem:[#allocation5 + $0x750] sm:$0xff]  ;;  %v4692_v57 = vcombine.high %v206_v51, %v210_v52  ;;  %v4691_v2 = vcombine.low %v206_v51, %v210_v52 }
 0x153   :  { %v338_v54 = vld [vmem:[#allocation5 + $0x770] sm:$0xff] }
 0x154   :  { %3549 = vmatpush1.bf16.msra.mxu0 %v4619_v62  ;;  %3590 = vmatpush1.bf16.msra.mxu1 %v4747_v63  ;;  %v4820_v61 = vcombine.high %v334_v53, %v338_v54  ;;  %v198_v62 = vld [vmem:[#allocation5 + $0x310] sm:$0xff]  ;;  %v4819_v3 = vcombine.low %v334_v53, %v338_v54 }
 0x155   :  { %3550 = vmatprep.subr.bf16.mxu0 %v4612_v0  ;;  %3591 = vmatprep.subr.bf16.mxu1 %v4740_v1  ;;  %v202_v63 = vld [vmem:[#allocation5 + $0x330] sm:$0xff] }
 0x156   :  { %v326_v0 = vld [vmem:[#allocation5 + $0x710] sm:$0xff]  ;;  %v4684_v4 = vcombine.high %v198_v62, %v202_v63  ;;  %v4683_v11 = vcombine.low %v198_v62, %v202_v63 }
 0x157   :  { %v330_v1 = vld [vmem:[#allocation5 + $0x730] sm:$0xff] }
 0x158   :  { %3551 = vmatpush1.bf16.msra.mxu0 %v4611_v6  ;;  %3592 = vmatpush1.bf16.msra.mxu1 %v4739_v8  ;;  %v4812_v5 = vcombine.high %v326_v0, %v330_v1  ;;  %v190_v6 = vld [vmem:[#allocation5 + $0x2d0] sm:$0xff]  ;;  %v4811_v12 = vcombine.low %v326_v0, %v330_v1 }
 0x159   :  { %3552 = vmatprep.subr.bf16.mxu0 %v4604_v9  ;;  %3593 = vmatprep.subr.bf16.mxu1 %v4732_v10  ;;  %v194_v8 = vld [vmem:[#allocation5 + $0x2f0] sm:$0xff] }
 0x15a   :  { %v318_v9 = vld [vmem:[#allocation5 + $0x6d0] sm:$0xff]  ;;  %v4676_v13 = vcombine.high %v190_v6, %v194_v8  ;;  %v4675_v21 = vcombine.low %v190_v6, %v194_v8 }
 0x15b   :  { %v322_v10 = vld [vmem:[#allocation5 + $0x6f0] sm:$0xff] }
 0x15c   :  { %3553 = vmatpush1.bf16.msra.mxu0 %v4603_v15  ;;  %3594 = vmatpush1.bf16.msra.mxu1 %v4731_v17  ;;  %v4804_v14 = vcombine.high %v318_v9, %v322_v10  ;;  %v182_v15 = vld [vmem:[#allocation5 + $0x290] sm:$0xff]  ;;  %v4803_v22 = vcombine.low %v318_v9, %v322_v10 }
 0x15d   :  { %3554 = vmatprep.subr.bf16.mxu0 %v4596_v18  ;;  %3595 = vmatprep.subr.bf16.mxu1 %v4724_v19  ;;  %v186_v17 = vld [vmem:[#allocation5 + $0x2b0] sm:$0xff] }
 0x15e   :  { %v310_v18 = vld [vmem:[#allocation5 + $0x690] sm:$0xff]  ;;  %v4668_v23 = vcombine.high %v182_v15, %v186_v17  ;;  %v4667_v30 = vcombine.low %v182_v15, %v186_v17 }
 0x15f   :  { %v314_v19 = vld [vmem:[#allocation5 + $0x6b0] sm:$0xff] }
 0x160   :  { %3555 = vmatpush1.bf16.msra.mxu0 %v4595_v25  ;;  %3596 = vmatpush1.bf16.msra.mxu1 %v4723_v26  ;;  %v4796_v24 = vcombine.high %v310_v18, %v314_v19  ;;  %v174_v25 = vld [vmem:[#allocation5 + $0x250] sm:$0xff]  ;;  %v4795_v32 = vcombine.low %v310_v18, %v314_v19 }
 0x161   :  { %3556 = vmatprep.subr.bf16.mxu0 %v4588_v27  ;;  %3597 = vmatprep.subr.bf16.mxu1 %v4716_v29  ;;  %v178_v26 = vld [vmem:[#allocation5 + $0x270] sm:$0xff] }
 0x162   :  { %v302_v27 = vld [vmem:[#allocation5 + $0x650] sm:$0xff]  ;;  %v4660_v33 = vcombine.high %v174_v25, %v178_v26  ;;  %v4659_v42 = vcombine.low %v174_v25, %v178_v26 }
 0x163   :  { %v306_v29 = vld [vmem:[#allocation5 + $0x670] sm:$0xff] }
 0x164   :  { %3557 = vmatpush1.bf16.msra.mxu0 %v4587_v35  ;;  %3598 = vmatpush1.bf16.msra.mxu1 %v4715_v37  ;;  %v4788_v34 = vcombine.high %v302_v27, %v306_v29  ;;  %v166_v35 = vld [vmem:[#allocation5 + $0x210] sm:$0xff]  ;;  %v4787_v43 = vcombine.low %v302_v27, %v306_v29 }
 0x165   :  { %3558 = vmatprep.subr.bf16.mxu0 %v4708_v40  ;;  %3599 = vmatprep.subr.bf16.mxu1 %v4836_v41  ;;  %v170_v37 = vld [vmem:[#allocation5 + $0x230] sm:$0xff] }
 0x166   :  { %v294_v40 = vld [vmem:[#allocation5 + $0x610] sm:$0xff]  ;;  %v4652_v44 = vcombine.high %v166_v35, %v170_v37  ;;  %v4651_v51 = vcombine.low %v166_v35, %v170_v37 }
 0x167   :  { %v298_v41 = vld [vmem:[#allocation5 + $0x630] sm:$0xff] }
 0x168   :  { %3559 = vmatpush2.bf16.msra.mxu0 %v4707_v46  ;;  %3600 = vmatpush2.bf16.msra.mxu1 %v4835_v48  ;;  %v4780_v45 = vcombine.high %v294_v40, %v298_v41  ;;  %v414_v46 = vld [vmem:[#allocation5 + $0x9d0] sm:$0xff]  ;;  %v4779_v52 = vcombine.low %v294_v40, %v298_v41 }
 0x169   :  { %3560 = vmatprep.subr.bf16.mxu0 %v4700_v49  ;;  %3601 = vmatprep.subr.bf16.mxu1 %v4828_v50  ;;  %v418_v48 = vld [vmem:[#allocation5 + $0x9f0] sm:$0xff] }
 0x16a   :  { %v542_v49 = vld [vmem:[#allocation5 + $0xdd0] sm:$0xff]  ;;  %v4900_v53 = vcombine.high %v414_v46, %v418_v48  ;;  %v4899_v62 = vcombine.low %v414_v46, %v418_v48 }
 0x16b   :  { %v546_v50 = vld [vmem:[#allocation5 + $0xdf0] sm:$0xff] }
 0x16c   :  { %3561 = vmatpush2.bf16.msra.mxu0 %v4699_v55  ;;  %3602 = vmatpush2.bf16.msra.mxu1 %v4827_v56  ;;  %v5028_v54 = vcombine.high %v542_v49, %v546_v50  ;;  %v406_v55 = vld [vmem:[#allocation5 + $0x990] sm:$0xff]  ;;  %v5027_v63 = vcombine.low %v542_v49, %v546_v50 }
 0x16d   :  { %3562 = vmatprep.subr.bf16.mxu0 %v4692_v57  ;;  %3603 = vmatprep.subr.bf16.mxu1 %v4820_v61  ;;  %v410_v56 = vld [vmem:[#allocation5 + $0x9b0] sm:$0xff] }
 0x16e   :  { %v534_v57 = vld [vmem:[#allocation5 + $0xd90] sm:$0xff]  ;;  %v4892_v0 = vcombine.high %v406_v55, %v410_v56  ;;  %v4891_v10 = vcombine.low %v406_v55, %v410_v56 }
 0x16f   :  { %v538_v61 = vld [vmem:[#allocation5 + $0xdb0] sm:$0xff] }
 0x170   :  { %3563 = vmatpush2.bf16.msra.mxu0 %v4691_v2  ;;  %3604 = vmatpush2.bf16.msra.mxu1 %v4819_v3  ;;  %v5020_v1 = vcombine.high %v534_v57, %v538_v61  ;;  %v398_v2 = vld [vmem:[#allocation5 + $0x950] sm:$0xff] }
 0x171   :  { %3564 = vmatprep.subr.bf16.mxu0 %v4684_v4  ;;  %3605 = vmatprep.subr.bf16.mxu1 %v4812_v5  ;;  %v402_v3 = vld [vmem:[#allocation5 + $0x970] sm:$0xff] }
 0x172   :  { %v526_v5 = vld [vmem:[#allocation5 + $0xd50] sm:$0xff]  ;;  %v4883_v26 = vcombine.low %v398_v2, %v402_v3 }
 0x173   :  { %v530_v6 = vld [vmem:[#allocation5 + $0xd70] sm:$0xff] }
 0x174   :  { %3565 = vmatpush2.bf16.msra.mxu0 %v4683_v11  ;;  %3606 = vmatpush2.bf16.msra.mxu1 %v4811_v12  ;;  %v5019_v12 = vcombine.low %v534_v57, %v538_v61  ;;  %v5012_v18 = vcombine.high %v526_v5, %v530_v6  ;;  %v390_v19 = vld [vmem:[#allocation5 + $0x910] sm:$0xff] }
 0x175   :  { %3566 = vmatprep.subr.bf16.mxu0 %v4676_v13  ;;  %3607 = vmatprep.subr.bf16.mxu1 %v4804_v14  ;;  %v4884_v13 = vcombine.high %v398_v2, %v402_v3  ;;  %v510_v35 = vld [vmem:[#allocation5 + $0xcd0] sm:$0xff] }
 0x176   :  { %v514_v37 = vld [vmem:[#allocation5 + $0xcf0] sm:$0xff] }
 0x177   :  { %v502_v46 = vld [vmem:[#allocation5 + $0xc90] sm:$0xff]  ;;  %v4995_v50 = vcombine.low %v510_v35, %v514_v37 }
 0x178   :  { %3567 = vmatpush2.bf16.msra.mxu0 %v4675_v21  ;;  %3608 = vmatpush2.bf16.msra.mxu1 %v4803_v22  ;;  %v394_v21 = vld [vmem:[#allocation5 + $0x930] sm:$0xff] }
 0x179   :  { %3568 = vmatprep.subr.bf16.mxu0 %v4668_v23  ;;  %3609 = vmatprep.subr.bf16.mxu1 %v4796_v24  ;;  %v518_v22 = vld [vmem:[#allocation5 + $0xd10] sm:$0xff]  ;;  %v4876_v29 = vcombine.high %v390_v19, %v394_v21  ;;  %v4875_v40 = vcombine.low %v390_v19, %v394_v21 }
 0x17a   :  { %v522_v23 = vld [vmem:[#allocation5 + $0xd30] sm:$0xff] }
 0x17b   :  { %v5003_v41 = vcombine.low %v518_v22, %v522_v23  ;;  %v506_v48 = vld [vmem:[#allocation5 + $0xcb0] sm:$0xff] }
 0x17c   :  { %3569 = vmatpush2.bf16.msra.mxu0 %v4667_v30  ;;  %3610 = vmatpush2.bf16.msra.mxu1 %v4795_v32  ;;  %v5004_v32 = vcombine.high %v518_v22, %v522_v23  ;;  %v494_v55 = vld [vmem:[#allocation5 + $0xc50] sm:$0xff]  ;;  %v4987_v61 = vcombine.low %v502_v46, %v506_v48 }
 0x17d   :  { %3570 = vmatprep.subr.bf16.mxu0 %v4660_v33  ;;  %3611 = vmatprep.subr.bf16.mxu1 %v4788_v34  ;;  %v382_v33 = vld [vmem:[#allocation5 + $0x8d0] sm:$0xff] }
 0x17e   :  { %v386_v34 = vld [vmem:[#allocation5 + $0x8f0] sm:$0xff] }
 0x17f   :  { %v4867_v49 = vcombine.low %v382_v33, %v386_v34  ;;  %v498_v56 = vld [vmem:[#allocation5 + $0xc70] sm:$0xff] }
 0x180   :  { %3571 = vmatpush2.bf16.msra.mxu0 %v4659_v42  ;;  %3612 = vmatpush2.bf16.msra.mxu1 %v4787_v43  ;;  %v4868_v42 = vcombine.high %v382_v33, %v386_v34  ;;  %v4996_v43 = vcombine.high %v510_v35, %v514_v37  ;;  %v486_v2 = vld [vmem:[#allocation5 + $0xc10] sm:$0xff] }
 0x181   :  { %3572 = vmatprep.subr.bf16.mxu0 %v4652_v44  ;;  %3613 = vmatprep.subr.bf16.mxu1 %v4780_v45  ;;  %v374_v44 = vld [vmem:[#allocation5 + $0x890] sm:$0xff] }
 0x182   :  { %v378_v45 = vld [vmem:[#allocation5 + $0x8b0] sm:$0xff] }
 0x183   :  { %v4859_v57 = vcombine.low %v374_v44, %v378_v45  ;;  %v490_v3 = vld [vmem:[#allocation5 + $0xc30] sm:$0xff] }
 0x184   :  { %3573 = vmatpush2.bf16.msra.mxu0 %v4651_v51  ;;  %3614 = vmatpush2.bf16.msra.mxu1 %v4779_v52  ;;  %v4860_v51 = vcombine.high %v374_v44, %v378_v45  ;;  %v4988_v52 = vcombine.high %v502_v46, %v506_v48  ;;  %v470_v19 = vld [vmem:[#allocation5 + $0xb90] sm:$0xff] }
 0x185   :  { %3624 = vmatprep.subr.bf16.mxu0 %v4900_v53  ;;  %3665 = vmatprep.subr.bf16.mxu1 %v5028_v54  ;;  %v366_v53 = vld [vmem:[#allocation5 + $0x850] sm:$0xff] }
 0x186   :  { %v370_v54 = vld [vmem:[#allocation5 + $0x870] sm:$0xff] }
 0x187   :  { %v3330_v4 = vpop.f32.mrf.mxu0  ;;  %3575 = vmatmul.mubr.bf16.vlgmr.msra.gmra.mxu0 %v5512_v16  ;;  %v3371_v9 = vpop.f32.mrf.mxu1  ;;  %3616 = vmatmul.mubr.bf16.vlgmr.msra.gmra.mxu1 %v5514_v20  ;;  %v474_v21 = vld [vmem:[#allocation5 + $0xbb0] sm:$0xff] }
 0x188   :  { %v3331_v8 = vadd.f32 %v3330_v4, %v5546_v36  ;;  %3625 = vmatpush1.bf16.msra.mxu0 %v4899_v62  ;;  %3666 = vmatpush1.bf16.msra.mxu1 %v5027_v63  ;;  %v4852_v62 = vcombine.high %v366_v53, %v370_v54  ;;  %v4980_v63 = vcombine.high %v494_v55, %v498_v56  ;;  %v602_v22 = vld [vmem:[#allocation5 + $0xfb0] sm:$0xff] }
 0x189   :  { %v3332_v11 = vpop.f32.mrf.mxu0  ;;  %3626 = vmatprep.subr.bf16.mxu0 %v4892_v0  ;;  %v3373_v17 = vpop.f32.mrf.mxu1  ;;  %3667 = vmatprep.subr.bf16.mxu1 %v5020_v1  ;;  %v358_v0 = vld [vmem:[#allocation5 + $0x810] sm:$0xff]  ;;  %v4851_v4 = vcombine.low %v366_v53, %v370_v54  ;;  %v4955_v33 = vcombine.low %v470_v19, %v474_v21 }
 0x18a   :  { %v5555_v14 = vadd.f32 %v3371_v9, %v3331_v8  ;;  %v3333_v15 = vadd.f32 %v3332_v11, %v5550_v47  ;;  %3656 = vmatprep.mubr.bf16.mxu0 %v5516_v28  ;;  %3697 = vmatprep.mubr.bf16.mxu1 %v5519_v31  ;;  %v5011_v47 = vcombine.low %v526_v5, %v530_v6  ;;  %v362_v1 = vld [vmem:[#allocation5 + $0x830] sm:$0xff] }
 0x18b   :  { %v3334_v36 = vpop.f32.mrf.mxu0  ;;  %v3375_v25 = vpop.f32.mrf.mxu1  ;;  %v4979_v5 = vcombine.low %v494_v55, %v498_v56  ;;  %v4844_v6 = vcombine.high %v358_v0, %v362_v1  ;;  %v4972_v8 = vcombine.high %v486_v2, %v490_v3  ;;  %v478_v9 = vld [vmem:[#allocation5 + $0xbd0] sm:$0xff] }
 0x18c   :  { %v5560_v24 = vadd.f32 %v3373_v17, %v3333_v15  ;;  %3627 = vmatpush1.bf16.msra.mxu0 %v4891_v10  ;;  %3668 = vmatpush1.bf16.msra.mxu1 %v5019_v12  ;;  %v482_v10 = vld [vmem:[#allocation5 + $0xbf0] sm:$0xff]  ;;  %v4971_v15 = vcombine.low %v486_v2, %v490_v3 }
 0x18d   :  { %v3335_v27 = vpop.f32.mrf.mxu0  ;;  %3628 = vmatprep.subr.bf16.mxu0 %v4884_v13  ;;  %v3376_v30 = vpop.f32.mrf.mxu1  ;;  %3669 = vmatprep.subr.bf16.mxu1 %v5012_v18  ;;  %v606_v11 = vld [vmem:[#allocation5 + $0xfd0] sm:$0xff]  ;;  %v4843_v13 = vcombine.low %v358_v0, %v362_v1  ;;  %v4964_v17 = vcombine.high %v478_v9, %v482_v10  ;;  %v4963_v23 = vcombine.low %v478_v9, %v482_v10 }
 0x18e   :  { %v610_v12 = vld [vmem:[#allocation5 + $0xff0] sm:$0xff] }
 0x18f   :  { %v5092_v18 = vcombine.high %v606_v11, %v610_v12  ;;  %v598_v36 = vld [vmem:[#allocation5 + $0xf90] sm:$0xff]  ;;  %v5091_v25 = vcombine.low %v606_v11, %v610_v12 }
 0x190   :  { %3629 = vmatpush1.bf16.msra.mxu0 %v4883_v26  ;;  %3670 = vmatpush1.bf16.msra.mxu1 %v5011_v47  ;;  %v4956_v26 = vcombine.high %v470_v19, %v474_v21  ;;  %v5084_v27 = vcombine.high %v598_v36, %v602_v22  ;;  %v462_v47 = vld [vmem:[#allocation5 + $0xb50] sm:$0xff]  ;;  %v5083_v34 = vcombine.low %v598_v36, %v602_v22 }
 0x191   :  { %3630 = vmatprep.subr.bf16.mxu0 %v4876_v29  ;;  %3671 = vmatprep.subr.bf16.mxu1 %v5004_v32  ;;  %v466_v29 = vld [vmem:[#allocation5 + $0xb70] sm:$0xff] }
 0x192   :  { %v590_v30 = vld [vmem:[#allocation5 + $0xf50] sm:$0xff]  ;;  %v4948_v35 = vcombine.high %v462_v47, %v466_v29  ;;  %v4947_v44 = vcombine.low %v462_v47, %v466_v29  ;;  %v624_v29 = vsub.s32 2, %v5536_v60 }
 0x193   :  { %v594_v32 = vld [vmem:[#allocation5 + $0xf70] sm:$0xff] }
 0x194   :  { %3631 = vmatpush1.bf16.msra.mxu0 %v4875_v40  ;;  %3672 = vmatpush1.bf16.msra.mxu1 %v5003_v41  ;;  %v5076_v37 = vcombine.high %v590_v30, %v594_v32  ;;  %v454_v40 = vld [vmem:[#allocation5 + $0xb10] sm:$0xff]  ;;  %v5075_v45 = vcombine.low %v590_v30, %v594_v32 }
 0x195   :  { %3632 = vmatprep.subr.bf16.mxu0 %v4868_v42  ;;  %3673 = vmatprep.subr.bf16.mxu1 %v4996_v43  ;;  %v458_v41 = vld [vmem:[#allocation5 + $0xb30] sm:$0xff] }
 0x196   :  { %v582_v42 = vld [vmem:[#allocation5 + $0xf10] sm:$0xff]  ;;  %v4940_v46 = vcombine.high %v454_v40, %v458_v41  ;;  %v4939_v53 = vcombine.low %v454_v40, %v458_v41  ;;  %v279_v40 = vld [vmem:[#allocation5 + $0x598] sm:$0xff] }
 0x197   :  { %v586_v43 = vld [vmem:[#allocation5 + $0xf30] sm:$0xff]  ;;  %v283_v41 = vld [vmem:[#allocation5 + $0x5b8] sm:$0xff] }
 0x198   :  { %3633 = vmatpush1.bf16.msra.mxu0 %v4867_v49  ;;  %3674 = vmatpush1.bf16.msra.mxu1 %v4995_v50  ;;  %v5068_v48 = vcombine.high %v582_v42, %v586_v43  ;;  %v446_v49 = vld [vmem:[#allocation5 + $0xad0] sm:$0xff]  ;;  %v5067_v54 = vcombine.low %v582_v42, %v586_v43  ;;  %v625_v42 = vrot.slane %v5539_v7, %v624_v29 }
 0x199   :  { %3634 = vmatprep.subr.bf16.mxu0 %v4860_v51  ;;  %3675 = vmatprep.subr.bf16.mxu1 %v4988_v52  ;;  %v450_v50 = vld [vmem:[#allocation5 + $0xaf0] sm:$0xff] }
 0x19a   :  { %v574_v51 = vld [vmem:[#allocation5 + $0xed0] sm:$0xff]  ;;  %v4932_v55 = vcombine.high %v446_v49, %v450_v50  ;;  %v4931_v0 = vcombine.low %v446_v49, %v450_v50  ;;  %v143_v49 = vld [vmem:[#allocation5 + $0x158] sm:$0xff] }
 0x19b   :  { %v578_v52 = vld [vmem:[#allocation5 + $0xef0] sm:$0xff]  ;;  %v147_v50 = vld [vmem:[#allocation5 + $0x178] sm:$0xff] }
 0x19c   :  { %3635 = vmatpush1.bf16.msra.mxu0 %v4859_v57  ;;  %3676 = vmatpush1.bf16.msra.mxu1 %v4987_v61  ;;  %v5060_v56 = vcombine.high %v574_v51, %v578_v52  ;;  %v438_v57 = vld [vmem:[#allocation5 + $0xa90] sm:$0xff]  ;;  %v5059_v1 = vcombine.low %v574_v51, %v578_v52  ;;  %v271_v52 = vld [vmem:[#allocation5 + $0x558] sm:$0xff] }
 0x19d   :  { %3636 = vmatprep.subr.bf16.mxu0 %v4852_v62  ;;  %3677 = vmatprep.subr.bf16.mxu1 %v4980_v63  ;;  %v442_v61 = vld [vmem:[#allocation5 + $0xab0] sm:$0xff] }
 0x19e   :  { %v566_v62 = vld [vmem:[#allocation5 + $0xe90] sm:$0xff]  ;;  %v4924_v2 = vcombine.high %v438_v57, %v442_v61  ;;  %v4923_v9 = vcombine.low %v438_v57, %v442_v61  ;;  %v4765_v61 = vcombine.low %v279_v40, %v283_v41 }
 0x19f   :  { %v570_v63 = vld [vmem:[#allocation5 + $0xeb0] sm:$0xff] }
 0x1a0   :  { %3637 = vmatpush1.bf16.msra.mxu0 %v4851_v4  ;;  %3678 = vmatpush1.bf16.msra.mxu1 %v4979_v5  ;;  %v5052_v3 = vcombine.high %v566_v62, %v570_v63  ;;  %v430_v4 = vld [vmem:[#allocation5 + $0xa50] sm:$0xff]  ;;  %v5051_v10 = vcombine.low %v566_v62, %v570_v63  ;;  %v4630_v62 = vcombine.high %v143_v49, %v147_v50 }
 0x1a1   :  { %3638 = vmatprep.subr.bf16.mxu0 %v4844_v6  ;;  %3679 = vmatprep.subr.bf16.mxu1 %v4972_v8  ;;  %v434_v5 = vld [vmem:[#allocation5 + $0xa70] sm:$0xff] }
 0x1a2   :  { %v558_v6 = vld [vmem:[#allocation5 + $0xe50] sm:$0xff]  ;;  %v4916_v11 = vcombine.high %v430_v4, %v434_v5  ;;  %v4915_v19 = vcombine.low %v430_v4, %v434_v5  ;;  %v263_v5 = vld [vmem:[#allocation5 + $0x518] sm:$0xff] }
 0x1a3   :  { %v562_v8 = vld [vmem:[#allocation5 + $0xe70] sm:$0xff] }
 0x1a4   :  { %3639 = vmatpush1.bf16.msra.mxu0 %v4843_v13  ;;  %3680 = vmatpush1.bf16.msra.mxu1 %v4971_v15  ;;  %v5044_v12 = vcombine.high %v558_v6, %v562_v8  ;;  %v422_v13 = vld [vmem:[#allocation5 + $0xa10] sm:$0xff]  ;;  %v5043_v21 = vcombine.low %v558_v6, %v562_v8  ;;  %v267_v6 = vld [vmem:[#allocation5 + $0x538] sm:$0xff] }
 0x1a5   :  { %3640 = vmatprep.subr.bf16.mxu0 %v4964_v17  ;;  %3681 = vmatprep.subr.bf16.mxu1 %v5092_v18  ;;  %v426_v15 = vld [vmem:[#allocation5 + $0xa30] sm:$0xff] }
 0x1a6   :  { %v550_v17 = vld [vmem:[#allocation5 + $0xe10] sm:$0xff]  ;;  %v4908_v36 = vcombine.high %v422_v13, %v426_v15  ;;  %v4907_v47 = vcombine.low %v422_v13, %v426_v15 }
 0x1a7   :  { %v554_v18 = vld [vmem:[#allocation5 + $0xe30] sm:$0xff] }
 0x1a8   :  { %3641 = vmatpush2.bf16.msra.mxu0 %v4963_v23  ;;  %3682 = vmatpush2.bf16.msra.mxu1 %v5091_v25  ;;  %v5036_v22 = vcombine.high %v550_v17, %v554_v18  ;;  %v159_v23 = vld [vmem:[#allocation5 + $0x1d8] sm:$0xff]  ;;  %v5035_v30 = vcombine.low %v550_v17, %v554_v18  ;;  %v4750_v17 = vcombine.high %v263_v5, %v267_v6 }
 0x1a9   :  { %3642 = vmatprep.subr.bf16.mxu0 %v4956_v26  ;;  %3683 = vmatprep.subr.bf16.mxu1 %v5084_v27  ;;  %v163_v25 = vld [vmem:[#allocation5 + $0x1f8] sm:$0xff] }
 0x1aa   :  { %v287_v26 = vld [vmem:[#allocation5 + $0x5d8] sm:$0xff]  ;;  %v4646_v32 = vcombine.high %v159_v23, %v163_v25  ;;  %v4645_v43 = vcombine.low %v159_v23, %v163_v25 }
 0x1ab   :  { %v291_v27 = vld [vmem:[#allocation5 + $0x5f8] sm:$0xff] }
 0x1ac   :  { %3643 = vmatpush2.bf16.msra.mxu0 %v4955_v33  ;;  %3684 = vmatpush2.bf16.msra.mxu1 %v5083_v34  ;;  %v4774_v33 = vcombine.high %v287_v26, %v291_v27  ;;  %v628_v34 = vsub.s32 3, %v5536_v60  ;;  %v127_v18 = vld [vmem:[#allocation5 + $0xd8] sm:$0xff] }
 0x1ad   :  { %3644 = vmatprep.subr.bf16.mxu0 %v4948_v35  ;;  %3685 = vmatprep.subr.bf16.mxu1 %v5076_v37  ;;  %v151_v35 = vld [vmem:[#allocation5 + $0x198] sm:$0xff] }
 0x1ae   :  { %v155_v37 = vld [vmem:[#allocation5 + $0x1b8] sm:$0xff] }
 0x1af   :  { %v119_v25 = vld [vmem:[#allocation5 + $0x98] sm:$0xff] }
 0x1b0   :  { %3645 = vmatpush2.bf16.msra.mxu0 %v4947_v44  ;;  %3686 = vmatpush2.bf16.msra.mxu1 %v5075_v45  ;;  %v4773_v44 = vcombine.low %v287_v26, %v291_v27  ;;  %v4638_v45 = vcombine.high %v151_v35, %v155_v37  ;;  %v123_v26 = vld [vmem:[#allocation5 + $0xb8] sm:$0xff] }
 0x1b1   :  { %3646 = vmatprep.subr.bf16.mxu0 %v4940_v46  ;;  %3687 = vmatprep.subr.bf16.mxu1 %v5068_v48  ;;  %v629_v46 = vrot.slane %v5539_v7, %v628_v34  ;;  %v4766_v48 = vcombine.high %v279_v40, %v283_v41  ;;  %v247_v27 = vld [vmem:[#allocation5 + $0x498] sm:$0xff]  ;;  %v4605_v41 = vcombine.low %v119_v25, %v123_v26 }
 0x1b2   :  { %v111_v34 = vld [vmem:[#allocation5 + $0x58] sm:$0xff] }
 0x1b3   :  { %v243_v40 = vld [vmem:[#allocation5 + $0x478] sm:$0xff] }
 0x1b4   :  { %3647 = vmatpush2.bf16.msra.mxu0 %v4939_v53  ;;  %3688 = vmatpush2.bf16.msra.mxu1 %v5067_v54  ;;  %v275_v53 = vld [vmem:[#allocation5 + $0x578] sm:$0xff] }
 0x1b5   :  { %3648 = vmatprep.subr.bf16.mxu0 %v4932_v55  ;;  %3689 = vmatprep.subr.bf16.mxu1 %v5060_v56  ;;  %v4637_v56 = vcombine.low %v151_v35, %v155_v37  ;;  %v115_v35 = vld [vmem:[#allocation5 + $0x78] sm:$0xff] }
 0x1b6   :  { %v239_v37 = vld [vmem:[#allocation5 + $0x458] sm:$0xff] }
 0x1b8   :  { %3649 = vmatpush2.bf16.msra.mxu0 %v4931_v0  ;;  %3690 = vmatpush2.bf16.msra.mxu1 %v5059_v1  ;;  %v4758_v1 = vcombine.high %v271_v52, %v275_v53 }
 0x1b9   :  { %3650 = vmatprep.subr.bf16.mxu0 %v4924_v2  ;;  %3691 = vmatprep.subr.bf16.mxu1 %v5052_v3  ;;  %v135_v2 = vld [vmem:[#allocation5 + $0x118] sm:$0xff] }
 0x1ba   :  { %v139_v3 = vld [vmem:[#allocation5 + $0x138] sm:$0xff] }
 0x1bb   :  { %v4622_v13 = vcombine.high %v135_v2, %v139_v3 }
 0x1bc   :  { %3651 = vmatpush2.bf16.msra.mxu0 %v4923_v9  ;;  %3692 = vmatpush2.bf16.msra.mxu1 %v5051_v10  ;;  %v4629_v10 = vcombine.low %v143_v49, %v147_v50  ;;  %v235_v49 = vld [vmem:[#allocation5 + $0x438] sm:$0xff]  ;;  %v4597_v50 = vcombine.low %v111_v34, %v115_v35 }
 0x1bd   :  { %3652 = vmatprep.subr.bf16.mxu0 %v4916_v11  ;;  %3693 = vmatprep.subr.bf16.mxu1 %v5044_v12  ;;  %v4757_v12 = vcombine.low %v271_v52, %v275_v53 }
 0x1c0   :  { %3653 = vmatpush2.bf16.msra.mxu0 %v4915_v19  ;;  %3694 = vmatpush2.bf16.msra.mxu1 %v5043_v21  ;;  %v255_v19 = vld [vmem:[#allocation5 + $0x4d8] sm:$0xff] }
 0x1c1   :  { %3654 = vmatprep.subr.bf16.mxu0 %v4908_v36  ;;  %3695 = vmatprep.subr.bf16.mxu1 %v5036_v22  ;;  %v259_v21 = vld [vmem:[#allocation5 + $0x4f8] sm:$0xff]  ;;  %v4621_v36 = vcombine.low %v135_v2, %v139_v3 }
 0x1c2   :  { %v4742_v23 = vcombine.high %v255_v19, %v259_v21  ;;  %v219_v2 = vld [vmem:[#allocation5 + $0x3b8] sm:$0xff] }
 0x1c3   :  { %v343_v3 = vld [vmem:[#allocation5 + $0x798] sm:$0xff] }
 0x1c4   :  { %3655 = vmatpush2.bf16.msra.mxu0 %v4907_v47  ;;  %3696 = vmatpush2.bf16.msra.mxu1 %v5035_v30  ;;  %v251_v47 = vld [vmem:[#allocation5 + $0x4b8] sm:$0xff]  ;;  %v4741_v30 = vcombine.low %v255_v19, %v259_v21 }
 0x1c5   :  { %3706 = vmatprep.subr.bf16.mxu0 %v4646_v32  ;;  %3747 = vmatprep.subr.bf16.mxu1 %v4774_v33  ;;  %v4606_v32 = vcombine.high %v119_v25, %v123_v26  ;;  %v4734_v33 = vcombine.high %v247_v27, %v251_v47  ;;  %v199_v21 = vld [vmem:[#allocation5 + $0x318] sm:$0xff] }
 0x1c7   :  { %v3412_v51 = vpop.f32.mrf.mxu0  ;;  %3657 = vmatmul.mubr.bf16.vlgmr.msra.gmra.mxu0 %v5524_v38  ;;  %v3453_v55 = vpop.f32.mrf.mxu1  ;;  %3698 = vmatmul.mubr.bf16.vlgmr.msra.gmra.mxu1 %v5526_v39 }
 0x1c8   :  { %v3413_v54 = vadd.f32 %v3412_v51, %v625_v42  ;;  %3707 = vmatpush1.bf16.msra.mxu0 %v4645_v43  ;;  %3748 = vmatpush1.bf16.msra.mxu1 %v4773_v44  ;;  %v4733_v42 = vcombine.low %v247_v27, %v251_v47  ;;  %v4598_v43 = vcombine.high %v111_v34, %v115_v35  ;;  %v191_v47 = vld [vmem:[#allocation5 + $0x2d8] sm:$0xff] }
 0x1c9   :  { %v3414_v57 = vpop.f32.mrf.mxu0  ;;  %3708 = vmatprep.subr.bf16.mxu0 %v4638_v45  ;;  %v3455_v0 = vpop.f32.mrf.mxu1  ;;  %3749 = vmatprep.subr.bf16.mxu1 %v4766_v48  ;;  %v4726_v44 = vcombine.high %v239_v37, %v243_v40  ;;  %v103_v45 = vld [vmem:[#allocation5 + $0x18] sm:$0xff]  ;;  %v4725_v51 = vcombine.low %v239_v37, %v243_v40 }
 0x1ca   :  { %v5568_v7 = vadd.f32 %v3453_v55, %v3413_v54  ;;  %v3415_v63 = vadd.f32 %v3414_v57, %v629_v46  ;;  %3738 = vmatprep.mubr.bf16.mxu0 %v5506_v58  ;;  %3779 = vmatprep.mubr.bf16.mxu1 %v5508_v59  ;;  %v131_v58 = vld [vmem:[#allocation5 + $0xf8] sm:$0xff]  ;;  %v4749_v59 = vcombine.low %v263_v5, %v267_v6 }
 0x1cb   :  { %v3416_v4 = vpop.f32.mrf.mxu0  ;;  %v3457_v9 = vpop.f32.mrf.mxu1  ;;  %v4614_v22 = vcombine.high %v127_v18, %v131_v58  ;;  %v4613_v29 = vcombine.low %v127_v18, %v131_v58  ;;  %v107_v46 = vld [vmem:[#allocation5 + $0x38] sm:$0xff] }
 0x1cc   :  { %v5572_v8 = vadd.f32 %v3455_v0, %v3415_v63  ;;  %3709 = vmatpush1.bf16.msra.mxu0 %v4637_v56  ;;  %3750 = vmatpush1.bf16.msra.mxu1 %v4765_v61  ;;  %v231_v48 = vld [vmem:[#allocation5 + $0x418] sm:$0xff]  ;;  %v4590_v52 = vcombine.high %v103_v45, %v107_v46  ;;  %v4589_v61 = vcombine.low %v103_v45, %v107_v46 }
 0x1cd   :  { %v3417_v11 = vpop.f32.mrf.mxu0  ;;  %3710 = vmatprep.subr.bf16.mxu0 %v4630_v62  ;;  %v3458_v15 = vpop.f32.mrf.mxu1  ;;  %3751 = vmatprep.subr.bf16.mxu1 %v4758_v1  ;;  %v4718_v53 = vcombine.high %v231_v48, %v235_v49  ;;  %v223_v54 = vld [vmem:[#allocation5 + $0x3d8] sm:$0xff]  ;;  %v4717_v62 = vcombine.low %v231_v48, %v235_v49 }
 0x1ce   :  { %v227_v55 = vld [vmem:[#allocation5 + $0x3f8] sm:$0xff] }
 0x1cf   :  { %v351_v56 = vld [vmem:[#allocation5 + $0x7d8] sm:$0xff]  ;;  %v4710_v63 = vcombine.high %v223_v54, %v227_v55  ;;  %v4709_v5 = vcombine.low %v223_v54, %v227_v55 }
 0x1d0   :  { %3711 = vmatpush1.bf16.msra.mxu0 %v4629_v10  ;;  %3752 = vmatpush1.bf16.msra.mxu1 %v4757_v12  ;;  %v355_v57 = vld [vmem:[#allocation5 + $0x7f8] sm:$0xff] }
 0x1d1   :  { %3712 = vmatprep.subr.bf16.mxu0 %v4622_v13  ;;  %3753 = vmatprep.subr.bf16.mxu1 %v4750_v17  ;;  %v4838_v0 = vcombine.high %v351_v56, %v355_v57  ;;  %v215_v1 = vld [vmem:[#allocation5 + $0x398] sm:$0xff]  ;;  %v4837_v6 = vcombine.low %v351_v56, %v355_v57 }
 0x1d2   :  { %v347_v4 = vld [vmem:[#allocation5 + $0x7b8] sm:$0xff]  ;;  %v4702_v9 = vcombine.high %v215_v1, %v219_v2  ;;  %v4701_v17 = vcombine.low %v215_v1, %v219_v2 }
 0x1d3   :  { %v4830_v10 = vcombine.high %v343_v3, %v347_v4  ;;  %v207_v11 = vld [vmem:[#allocation5 + $0x358] sm:$0xff]  ;;  %v4829_v18 = vcombine.low %v343_v3, %v347_v4 }
 0x1d4   :  { %3713 = vmatpush1.bf16.msra.mxu0 %v4621_v36  ;;  %3754 = vmatpush1.bf16.msra.mxu1 %v4749_v59  ;;  %v211_v12 = vld [vmem:[#allocation5 + $0x378] sm:$0xff] }
 0x1d5   :  { %3714 = vmatprep.subr.bf16.mxu0 %v4614_v22  ;;  %3755 = vmatprep.subr.bf16.mxu1 %v4742_v23  ;;  %v335_v13 = vld [vmem:[#allocation5 + $0x758] sm:$0xff]  ;;  %v4694_v58 = vcombine.high %v207_v11, %v211_v12  ;;  %v4693_v23 = vcombine.low %v207_v11, %v211_v12 }
 0x1d6   :  { %v339_v15 = vld [vmem:[#allocation5 + $0x778] sm:$0xff] }
 0x1d7   :  { %v4822_v19 = vcombine.high %v335_v13, %v339_v15  ;;  %v203_v36 = vld [vmem:[#allocation5 + $0x338] sm:$0xff]  ;;  %v4821_v25 = vcombine.low %v335_v13, %v339_v15 }
 0x1d8   :  { %3715 = vmatpush1.bf16.msra.mxu0 %v4613_v29  ;;  %3756 = vmatpush1.bf16.msra.mxu1 %v4741_v30  ;;  %v327_v59 = vld [vmem:[#allocation5 + $0x718] sm:$0xff]  ;;  %v4686_v26 = vcombine.high %v199_v21, %v203_v36 }
 0x1d9   :  { %3716 = vmatprep.subr.bf16.mxu0 %v4606_v32  ;;  %3757 = vmatprep.subr.bf16.mxu1 %v4734_v33  ;;  %v331_v22 = vld [vmem:[#allocation5 + $0x738] sm:$0xff]  ;;  %v4685_v33 = vcombine.low %v199_v21, %v203_v36 }
 0x1da   :  { %v4814_v27 = vcombine.high %v327_v59, %v331_v22  ;;  %v195_v29 = vld [vmem:[#allocation5 + $0x2f8] sm:$0xff]  ;;  %v4813_v34 = vcombine.low %v327_v59, %v331_v22 }
 0x1db   :  { %v319_v30 = vld [vmem:[#allocation5 + $0x6d8] sm:$0xff]  ;;  %v4678_v35 = vcombine.high %v191_v47, %v195_v29 }
 0x1dc   :  { %3717 = vmatpush1.bf16.msra.mxu0 %v4605_v41  ;;  %3758 = vmatpush1.bf16.msra.mxu1 %v4733_v42  ;;  %v323_v32 = vld [vmem:[#allocation5 + $0x6f8] sm:$0xff] }
 0x1dd   :  { %3718 = vmatprep.subr.bf16.mxu0 %v4598_v43  ;;  %3759 = vmatprep.subr.bf16.mxu1 %v4726_v44  ;;  %v4806_v37 = vcombine.high %v319_v30, %v323_v32  ;;  %v183_v40 = vld [vmem:[#allocation5 + $0x298] sm:$0xff]  ;;  %v4677_v44 = vcombine.low %v191_v47, %v195_v29  ;;  %v4805_v45 = vcombine.low %v319_v30, %v323_v32 }
 0x1de   :  { %v187_v41 = vld [vmem:[#allocation5 + $0x2b8] sm:$0xff] }
 0x1df   :  { %v311_v42 = vld [vmem:[#allocation5 + $0x698] sm:$0xff]  ;;  %v4670_v46 = vcombine.high %v183_v40, %v187_v41 }
 0x1e0   :  { %3719 = vmatpush1.bf16.msra.mxu0 %v4597_v50  ;;  %3760 = vmatpush1.bf16.msra.mxu1 %v4725_v51  ;;  %v315_v43 = vld [vmem:[#allocation5 + $0x6b8] sm:$0xff] }
 0x1e1   :  { %3720 = vmatprep.subr.bf16.mxu0 %v4590_v52  ;;  %3761 = vmatprep.subr.bf16.mxu1 %v4718_v53  ;;  %v4798_v48 = vcombine.high %v311_v42, %v315_v43  ;;  %v175_v49 = vld [vmem:[#allocation5 + $0x258] sm:$0xff]  ;;  %v4669_v53 = vcombine.low %v183_v40, %v187_v41  ;;  %v4797_v54 = vcombine.low %v311_v42, %v315_v43 }
 0x1e2   :  { %v179_v50 = vld [vmem:[#allocation5 + $0x278] sm:$0xff] }
 0x1e3   :  { %v303_v51 = vld [vmem:[#allocation5 + $0x658] sm:$0xff]  ;;  %v4662_v55 = vcombine.high %v175_v49, %v179_v50 }
 0x1e4   :  { %3721 = vmatpush1.bf16.msra.mxu0 %v4589_v61  ;;  %3762 = vmatpush1.bf16.msra.mxu1 %v4717_v62  ;;  %v307_v52 = vld [vmem:[#allocation5 + $0x678] sm:$0xff] }
 0x1e5   :  { %3722 = vmatprep.subr.bf16.mxu0 %v4710_v63  ;;  %3763 = vmatprep.subr.bf16.mxu1 %v4838_v0  ;;  %v4790_v56 = vcombine.high %v303_v51, %v307_v52  ;;  %v167_v57 = vld [vmem:[#allocation5 + $0x218] sm:$0xff]  ;;  %v4661_v0 = vcombine.low %v175_v49, %v179_v50  ;;  %v4789_v1 = vcombine.low %v303_v51, %v307_v52 }
 0x1e6   :  { %v171_v61 = vld [vmem:[#allocation5 + $0x238] sm:$0xff] }
 0x1e7   :  { %v295_v62 = vld [vmem:[#allocation5 + $0x618] sm:$0xff]  ;;  %v4654_v2 = vcombine.high %v167_v57, %v171_v61 }
 0x1e8   :  { %3723 = vmatpush2.bf16.msra.mxu0 %v4709_v5  ;;  %3764 = vmatpush2.bf16.msra.mxu1 %v4837_v6  ;;  %v299_v63 = vld [vmem:[#allocation5 + $0x638] sm:$0xff] }
 0x1e9   :  { %3724 = vmatprep.subr.bf16.mxu0 %v4702_v9  ;;  %3765 = vmatprep.subr.bf16.mxu1 %v4830_v10  ;;  %v4782_v3 = vcombine.high %v295_v62, %v299_v63  ;;  %v415_v4 = vld [vmem:[#allocation5 + $0x9d8] sm:$0xff]  ;;  %v4653_v10 = vcombine.low %v167_v57, %v171_v61  ;;  %v4781_v11 = vcombine.low %v295_v62, %v299_v63 }
 0x1ea   :  { %v419_v5 = vld [vmem:[#allocation5 + $0x9f8] sm:$0xff] }
 0x1eb   :  { %v543_v6 = vld [vmem:[#allocation5 + $0xdd8] sm:$0xff]  ;;  %v4902_v12 = vcombine.high %v415_v4, %v419_v5 }
 0x1ec   :  { %3725 = vmatpush2.bf16.msra.mxu0 %v4701_v17  ;;  %3766 = vmatpush2.bf16.msra.mxu1 %v4829_v18  ;;  %v547_v9 = vld [vmem:[#allocation5 + $0xdf8] sm:$0xff] }
 0x1ed   :  { %3726 = vmatprep.subr.bf16.mxu0 %v4694_v58  ;;  %3767 = vmatprep.subr.bf16.mxu1 %v4822_v19  ;;  %v5030_v13 = vcombine.high %v543_v6, %v547_v9  ;;  %v407_v15 = vld [vmem:[#allocation5 + $0x998] sm:$0xff]  ;;  %v4901_v19 = vcombine.low %v415_v4, %v419_v5  ;;  %v5029_v21 = vcombine.low %v543_v6, %v547_v9 }
 0x1ee   :  { %v411_v17 = vld [vmem:[#allocation5 + $0x9b8] sm:$0xff] }
 0x1ef   :  { %v535_v18 = vld [vmem:[#allocation5 + $0xd98] sm:$0xff]  ;;  %v4894_v36 = vcombine.high %v407_v15, %v411_v17  ;;  %v4893_v30 = vcombine.low %v407_v15, %v411_v17 }
 0x1f0   :  { %3727 = vmatpush2.bf16.msra.mxu0 %v4693_v23  ;;  %3768 = vmatpush2.bf16.msra.mxu1 %v4821_v25  ;;  %v539_v58 = vld [vmem:[#allocation5 + $0xdb8] sm:$0xff] }
 0x1f1   :  { %3728 = vmatprep.subr.bf16.mxu0 %v4686_v26  ;;  %3769 = vmatprep.subr.bf16.mxu1 %v4814_v27  ;;  %v5022_v59 = vcombine.high %v535_v18, %v539_v58  ;;  %v399_v22 = vld [vmem:[#allocation5 + $0x958] sm:$0xff] }
 0x1f2   :  { %v403_v23 = vld [vmem:[#allocation5 + $0x978] sm:$0xff] }
 0x1f3   :  { %v527_v26 = vld [vmem:[#allocation5 + $0xd58] sm:$0xff] }
 0x1f4   :  { %3729 = vmatpush2.bf16.msra.mxu0 %v4685_v33  ;;  %3770 = vmatpush2.bf16.msra.mxu1 %v4813_v34  ;;  %v531_v27 = vld [vmem:[#allocation5 + $0xd78] sm:$0xff]  ;;  %v5021_v33 = vcombine.low %v535_v18, %v539_v58  ;;  %v4886_v34 = vcombine.high %v399_v22, %v403_v23 }
 0x1f5   :  { %3730 = vmatprep.subr.bf16.mxu0 %v4678_v35  ;;  %3771 = vmatprep.subr.bf16.mxu1 %v4806_v37  ;;  %v391_v40 = vld [vmem:[#allocation5 + $0x918] sm:$0xff] }
 0x1f6   :  { %v395_v41 = vld [vmem:[#allocation5 + $0x938] sm:$0xff] }
 0x1f7   :  { %v523_v42 = vld [vmem:[#allocation5 + $0xd38] sm:$0xff] }
 0x1f8   :  { %3731 = vmatpush2.bf16.msra.mxu0 %v4677_v44  ;;  %3772 = vmatpush2.bf16.msra.mxu1 %v4805_v45  ;;  %v4885_v44 = vcombine.low %v399_v22, %v403_v23  ;;  %v383_v51 = vld [vmem:[#allocation5 + $0x8d8] sm:$0xff] }
 0x1f9   :  { %3732 = vmatprep.subr.bf16.mxu0 %v4670_v46  ;;  %3773 = vmatprep.subr.bf16.mxu1 %v4798_v48  ;;  %v5013_v46 = vcombine.low %v527_v26, %v531_v27  ;;  %v4878_v48 = vcombine.high %v391_v40, %v395_v41  ;;  %v387_v52 = vld [vmem:[#allocation5 + $0x8f8] sm:$0xff] }
 0x1fa   :  { %v375_v57 = vld [vmem:[#allocation5 + $0x898] sm:$0xff] }
 0x1fb   :  { %v379_v61 = vld [vmem:[#allocation5 + $0x8b8] sm:$0xff] }
 0x1fc   :  { %3733 = vmatpush2.bf16.msra.mxu0 %v4669_v53  ;;  %3774 = vmatpush2.bf16.msra.mxu1 %v4797_v54  ;;  %v511_v53 = vld [vmem:[#allocation5 + $0xcd8] sm:$0xff]  ;;  %v4877_v54 = vcombine.low %v391_v40, %v395_v41 }
 0x1fd   :  { %3734 = vmatprep.subr.bf16.mxu0 %v4662_v55  ;;  %3775 = vmatprep.subr.bf16.mxu1 %v4790_v56  ;;  %v4870_v55 = vcombine.high %v383_v51, %v387_v52  ;;  %v503_v62 = vld [vmem:[#allocation5 + $0xc98] sm:$0xff] }
 0x1fe   :  { %v507_v63 = vld [vmem:[#allocation5 + $0xcb8] sm:$0xff] }
 0x1ff   :  { %v367_v4 = vld [vmem:[#allocation5 + $0x858] sm:$0xff] }
 0x200   :  { %3735 = vmatpush2.bf16.msra.mxu0 %v4661_v0  ;;  %3776 = vmatpush2.bf16.msra.mxu1 %v4789_v1  ;;  %v4869_v0 = vcombine.low %v383_v51, %v387_v52  ;;  %v371_v5 = vld [vmem:[#allocation5 + $0x878] sm:$0xff] }
 0x201   :  { %3736 = vmatprep.subr.bf16.mxu0 %v4654_v2  ;;  %3777 = vmatprep.subr.bf16.mxu1 %v4782_v3  ;;  %v4862_v2 = vcombine.high %v375_v57, %v379_v61  ;;  %v4990_v3 = vcombine.high %v503_v62, %v507_v63  ;;  %v495_v6 = vld [vmem:[#allocation5 + $0xc58] sm:$0xff] }
 0x202   :  { %v499_v9 = vld [vmem:[#allocation5 + $0xc78] sm:$0xff] }
 0x203   :  { %v359_v15 = vld [vmem:[#allocation5 + $0x818] sm:$0xff] }
 0x204   :  { %3737 = vmatpush2.bf16.msra.mxu0 %v4653_v10  ;;  %3778 = vmatpush2.bf16.msra.mxu1 %v4781_v11  ;;  %v4861_v10 = vcombine.low %v375_v57, %v379_v61  ;;  %v4989_v11 = vcombine.low %v503_v62, %v507_v63  ;;  %v363_v17 = vld [vmem:[#allocation5 + $0x838] sm:$0xff] }
 0x205   :  { %3788 = vmatprep.subr.bf16.mxu0 %v4902_v12  ;;  %3829 = vmatprep.subr.bf16.mxu1 %v5030_v13  ;;  %v4854_v12 = vcombine.high %v367_v4, %v371_v5  ;;  %v4982_v13 = vcombine.high %v495_v6, %v499_v9  ;;  %v487_v18 = vld [vmem:[#allocation5 + $0xc18] sm:$0xff] }
 0x206   :  { %v491_v58 = vld [vmem:[#allocation5 + $0xc38] sm:$0xff] }
 0x207   :  { %v3494_v25 = vpop.f32.mrf.mxu0  ;;  %3739 = vmatmul.mubr.bf16.vlgmr.msra.gmra.mxu0 %v5512_v16  ;;  %v3535_v29 = vpop.f32.mrf.mxu1  ;;  %3780 = vmatmul.mubr.bf16.vlgmr.msra.gmra.mxu1 %v5514_v20  ;;  %v5014_v16 = vcombine.high %v527_v26, %v531_v27  ;;  %v519_v20 = vld [vmem:[#allocation5 + $0xd18] sm:$0xff]  ;;  %v4845_v27 = vcombine.low %v359_v15, %v363_v17 }
 0x208   :  { %v3495_v47 = vadd.f32 %v3494_v25, %v5568_v7  ;;  %3789 = vmatpush1.bf16.msra.mxu0 %v4901_v19  ;;  %3830 = vmatpush1.bf16.msra.mxu1 %v5029_v21  ;;  %v5006_v50 = vcombine.high %v519_v20, %v523_v42  ;;  %v4853_v19 = vcombine.low %v367_v4, %v371_v5  ;;  %v479_v22 = vld [vmem:[#allocation5 + $0xbd8] sm:$0xff] }
 0x209   :  { %v5577_v32 = vpop.f32.mrf.mxu0  ;;  %3790 = vmatprep.subr.bf16.mxu0 %v4894_v36  ;;  %v5581_v37 = vpop.f32.mrf.mxu1  ;;  %3831 = vmatprep.subr.bf16.mxu1 %v5022_v59  ;;  %v4981_v21 = vcombine.low %v495_v6, %v499_v9  ;;  %v4846_v36 = vcombine.high %v359_v15, %v363_v17  ;;  %v4974_v59 = vcombine.high %v487_v18, %v491_v58  ;;  %v483_v23 = vld [vmem:[#allocation5 + $0xbf8] sm:$0xff] }
 0x20a   :  { %v5579_v35 = vadd.f32 %v3535_v29, %v3495_v47  ;;  %3820 = vmatprep.mubr.bf16.mxu0 %v5516_v28  ;;  %3861 = vmatprep.mubr.bf16.mxu1 %v5519_v31  ;;  %v515_v28 = vld [vmem:[#allocation5 + $0xcf8] sm:$0xff]  ;;  %v5005_v31 = vcombine.low %v519_v20, %v523_v42  ;;  %v4973_v47 = vcombine.low %v487_v18, %v491_v58 }
 0x20b   :  { %v3498_v7 = vpop.f32.mrf.mxu0  ;;  %v3539_v43 = vpop.f32.mrf.mxu1  ;;  %v4998_v56 = vcombine.high %v511_v53, %v515_v28  ;;  %v4997_v1 = vcombine.low %v511_v53, %v515_v28  ;;  %v607_v25 = vld [vmem:[#allocation5 + $0xfd8] sm:$0xff]  ;;  %v4966_v29 = vcombine.high %v479_v22, %v483_v23  ;;  %v4965_v41 = vcombine.low %v479_v22, %v483_v23 }
 0x20c   :  { %3791 = vmatpush1.bf16.msra.mxu0 %v4893_v30  ;;  %3832 = vmatpush1.bf16.msra.mxu1 %v5021_v33  ;;  %v611_v26 = vld [vmem:[#allocation5 + $0xff8] sm:$0xff] }
 0x20d   :  { %v3499_v45 = vpop.f32.mrf.mxu0  ;;  %3792 = vmatprep.subr.bf16.mxu0 %v4886_v34  ;;  %v3540_v49 = vpop.f32.mrf.mxu1  ;;  %3833 = vmatprep.subr.bf16.mxu1 %v5014_v16  ;;  %v5094_v30 = vcombine.high %v607_v25, %v611_v26  ;;  %v471_v33 = vld [vmem:[#allocation5 + $0xb98] sm:$0xff]  ;;  %v5093_v7 = vcombine.low %v607_v25, %v611_v26 }
 0x20e   :  { %v475_v34 = vld [vmem:[#allocation5 + $0xbb8] sm:$0xff] }
 0x20f   :  { %v599_v16 = vld [vmem:[#allocation5 + $0xf98] sm:$0xff]  ;;  %v4958_v20 = vcombine.high %v471_v33, %v475_v34 }
 0x210   :  { %3793 = vmatpush1.bf16.msra.mxu0 %v4885_v44  ;;  %3834 = vmatpush1.bf16.msra.mxu1 %v5013_v46  ;;  %v603_v40 = vld [vmem:[#allocation5 + $0xfb8] sm:$0xff] }
 0x211   :  { %3794 = vmatprep.subr.bf16.mxu0 %v4878_v48  ;;  %3835 = vmatprep.subr.bf16.mxu1 %v5006_v50  ;;  %v5086_v42 = vcombine.high %v599_v16, %v603_v40  ;;  %v463_v43 = vld [vmem:[#allocation5 + $0xb58] sm:$0xff]  ;;  %v4957_v48 = vcombine.low %v471_v33, %v475_v34  ;;  %v5085_v49 = vcombine.low %v599_v16, %v603_v40 }
 0x212   :  { %v467_v44 = vld [vmem:[#allocation5 + $0xb78] sm:$0xff] }
 0x213   :  { %v591_v45 = vld [vmem:[#allocation5 + $0xf58] sm:$0xff]  ;;  %v4950_v50 = vcombine.high %v463_v43, %v467_v44 }
 0x214   :  { %3795 = vmatpush1.bf16.msra.mxu0 %v4877_v54  ;;  %3836 = vmatpush1.bf16.msra.mxu1 %v5005_v31  ;;  %v595_v46 = vld [vmem:[#allocation5 + $0xf78] sm:$0xff]  ;;  %v4949_v31 = vcombine.low %v463_v43, %v467_v44  ;;  %v5261_v43 = vld [vmem:[#allocation8 + $0xb8] sm:$0xff]  }
 0x215   :  { %3796 = vmatprep.subr.bf16.mxu0 %v4870_v55  ;;  %3837 = vmatprep.subr.bf16.mxu1 %v4998_v56  ;;  %v5078_v51 = vcombine.high %v591_v45, %v595_v46  ;;  %v455_v52 = vld [vmem:[#allocation5 + $0xb18] sm:$0xff]  ;;  %v5077_v55 = vcombine.low %v591_v45, %v595_v46 }
 0x216   :  { %v459_v53 = vld [vmem:[#allocation5 + $0xb38] sm:$0xff] }
 0x217   :  { %v583_v28 = vld [vmem:[#allocation5 + $0xf18] sm:$0xff]  ;;  %v4942_v56 = vcombine.high %v455_v52, %v459_v53 }
 0x218   :  { %3797 = vmatpush1.bf16.msra.mxu0 %v4869_v0  ;;  %3838 = vmatpush1.bf16.msra.mxu1 %v4997_v1  ;;  %v587_v54 = vld [vmem:[#allocation5 + $0xf38] sm:$0xff]  ;;  %v4941_v1 = vcombine.low %v455_v52, %v459_v53  ;;  %v5266_v52 = vld [vmem:[#allocation8 + $0x68] sm:$0xff]  }
 0x219   :  { %3798 = vmatprep.subr.bf16.mxu0 %v4862_v2  ;;  %3839 = vmatprep.subr.bf16.mxu1 %v4990_v3  ;;  %v5070_v57 = vcombine.high %v583_v28, %v587_v54  ;;  %v447_v61 = vld [vmem:[#allocation5 + $0xad8] sm:$0xff]  ;;  %v5069_v2 = vcombine.low %v583_v28, %v587_v54  ;;  %v5267_v28 = vld [vmem:[#allocation8 + $0xe8] sm:$0xff]  }
 0x21a   :  { %v451_v62 = vld [vmem:[#allocation5 + $0xaf8] sm:$0xff] }
 0x21b   :  { %v575_v63 = vld [vmem:[#allocation5 + $0xed8] sm:$0xff]  ;;  %v4934_v3 = vcombine.high %v447_v61, %v451_v62 }
 0x21c   :  { %3799 = vmatpush1.bf16.msra.mxu0 %v4861_v10  ;;  %3840 = vmatpush1.bf16.msra.mxu1 %v4989_v11  ;;  %v579_v0 = vld [vmem:[#allocation5 + $0xef8] sm:$0xff]  ;;  %v4933_v11 = vcombine.low %v447_v61, %v451_v62  ;;  %v5271_v61 = vld [vmem:[#allocation8 + $0xe0] sm:$0xff]  }
 0x21d   :  { %3800 = vmatprep.subr.bf16.mxu0 %v4854_v12  ;;  %3841 = vmatprep.subr.bf16.mxu1 %v4982_v13  ;;  %v5062_v4 = vcombine.high %v575_v63, %v579_v0  ;;  %v439_v5 = vld [vmem:[#allocation5 + $0xa98] sm:$0xff]  ;;  %v5061_v12 = vcombine.low %v575_v63, %v579_v0  ;;  %v5272_v62 = vld [vmem:[#allocation8 + $0x20] sm:$0xff]   ;;  %v5274_v0 = vld [vmem:[#allocation8 + $0x58] sm:$0xff]  }
 0x21e   :  { %v443_v6 = vld [vmem:[#allocation5 + $0xab8] sm:$0xff]  ;;  %v5273_v63 = vld [vmem:[#allocation8 + $0xa0] sm:$0xff]  }
 0x21f   :  { %v567_v9 = vld [vmem:[#allocation5 + $0xe98] sm:$0xff]  ;;  %v4926_v13 = vcombine.high %v439_v5, %v443_v6 }
 0x220   :  { %3801 = vmatpush1.bf16.msra.mxu0 %v4853_v19  ;;  %3842 = vmatpush1.bf16.msra.mxu1 %v4981_v21  ;;  %v571_v10 = vld [vmem:[#allocation5 + $0xeb8] sm:$0xff]  ;;  %v4925_v21 = vcombine.low %v439_v5, %v443_v6 }
 0x221   :  { %3802 = vmatprep.subr.bf16.mxu0 %v4846_v36  ;;  %3843 = vmatprep.subr.bf16.mxu1 %v4974_v59  ;;  %v5054_v15 = vcombine.high %v567_v9, %v571_v10  ;;  %v431_v17 = vld [vmem:[#allocation5 + $0xa58] sm:$0xff]  ;;  %v5053_v36 = vcombine.low %v567_v9, %v571_v10  ;;  %v5282_v10 = vld [vmem:[#allocation8 + $0x48] sm:$0xff]  }
 0x222   :  { %v435_v18 = vld [vmem:[#allocation5 + $0xa78] sm:$0xff] }
 0x223   :  { %v559_v58 = vld [vmem:[#allocation5 + $0xe58] sm:$0xff]  ;;  %v4918_v59 = vcombine.high %v431_v17, %v435_v18 }
 0x224   :  { %3803 = vmatpush1.bf16.msra.mxu0 %v4845_v27  ;;  %3844 = vmatpush1.bf16.msra.mxu1 %v4973_v47  ;;  %v563_v19 = vld [vmem:[#allocation5 + $0xe78] sm:$0xff]  ;;  %v3497_v47 = vadd.f32 %v5577_v32, %v5572_v8  ;;  %v3871_v8 = vmax.f32 %v5560_v24, 0.0 }
 0x225   :  { %3804 = vmatprep.subr.bf16.mxu0 %v4966_v29  ;;  %3845 = vmatprep.subr.bf16.mxu1 %v5094_v30  ;;  %v5046_v22 = vcombine.high %v559_v58, %v563_v19  ;;  %v423_v23 = vld [vmem:[#allocation5 + $0xa18] sm:$0xff]  ;;  %v4917_v29 = vcombine.low %v431_v17, %v435_v18  ;;  %v5045_v30 = vcombine.low %v559_v58, %v563_v19  ;;  %v5287_v17 = vld [vmem:[#allocation8 + $0xc0] sm:$0xff]   ;;  %v3870_v58 = vmax.f32 %v5555_v14, 0.0 }
 0x226   :  { %v427_v25 = vld [vmem:[#allocation5 + $0xa38] sm:$0xff]  ;;  %v3538_v16 = vadd.f32 %v5581_v37, %v3497_v47  ;;  %v3879_v45 = vpack.c.bf16 %v3871_v8, %v3871_v8  ;;  %v5288_v18 = vld [vmem:[#allocation8] sm:$0xff]   ;;  %v5314_v8 = vld [vmem:[#allocation8 + $0x1d8] sm:$0xff]  }
 0x227   :  { %v551_v26 = vld [vmem:[#allocation5 + $0xe18] sm:$0xff]  ;;  %v4910_v33 = vcombine.high %v423_v23, %v427_v25  ;;  %v4909_v40 = vcombine.low %v423_v23, %v427_v25  ;;  %v5289_v19 = vld [vmem:[#allocation8 + $0x80] sm:$0xff]   ;;  %v3878_v23 = vpack.c.bf16 %v3870_v58, %v3870_v58 }
 0x228   :  { %3805 = vmatpush2.bf16.msra.mxu0 %v4965_v41  ;;  %3846 = vmatpush2.bf16.msra.mxu1 %v5093_v7  ;;  %v555_v27 = vld [vmem:[#allocation5 + $0xe38] sm:$0xff]  ;;  %v5258_v7 = vld [vmem:[#allocation8 + $0x78] sm:$0xff]   ;;  %v3873_v32 = vmax.f32 %v3538_v16, 0.0  ;;  %v5311_v16 = vld [vmem:[#allocation8 + $0x1a8] sm:$0xff]  }
 0x229   :  { %3806 = vmatprep.subr.bf16.mxu0 %v4958_v20  ;;  %3847 = vmatprep.subr.bf16.mxu1 %v5086_v42  ;;  %v5038_v34 = vcombine.high %v551_v26, %v555_v27  ;;  %v5037_v41 = vcombine.low %v551_v26, %v555_v27  ;;  %v5259_v20 = vld [vmem:[#allocation8 + $0xf8] sm:$0xff]   ;;  %v5262_v44 = vld [vmem:[#allocation8 + $0x70] sm:$0xff]  }
 0x22a   :  { %v5260_v42 = vld [vmem:[#allocation8 + $0x38] sm:$0xff]   ;;  %v5263_v46 = vld [vmem:[#allocation8 + $0xf0] sm:$0xff]  }
 0x22b   :  { %v5264_v24 = vld [vmem:[#allocation8 + $0x30] sm:$0xff]   ;;  %v5307_v26 = vld [vmem:[#allocation8 + $0x1b8] sm:$0xff]  }
 0x22c   :  { %3807 = vmatpush2.bf16.msra.mxu0 %v4957_v48  ;;  %3848 = vmatpush2.bf16.msra.mxu1 %v5085_v49  ;;  %v3881_v48 = vpack.c.bf16 %v3873_v32, %v3873_v32  ;;  %v5279_v5 = vld [vmem:[#allocation8 + $0xd0] sm:$0xff]   ;;  %v5299_v32 = vld [vmem:[#allocation8 + $0x118] sm:$0xff]  }
 0x22d   :  { %3808 = vmatprep.subr.bf16.mxu0 %v4950_v50  ;;  %3849 = vmatprep.subr.bf16.mxu1 %v5078_v51  ;;  %v5265_v51 = vld [vmem:[#allocation8 + $0xb0] sm:$0xff]  }
 0x22e   :  { %v5280_v6 = vld [vmem:[#allocation8 + $0x10] sm:$0xff]  }
 0x22f   :  { %v5281_v9 = vld [vmem:[#allocation8 + $0x90] sm:$0xff]  }
 0x230   :  { %3809 = vmatpush2.bf16.msra.mxu0 %v4949_v31  ;;  %3850 = vmatpush2.bf16.msra.mxu1 %v5077_v55  ;;  %v5268_v31 = vld [vmem:[#allocation8 + $0x28] sm:$0xff]   ;;  %v5292_v25 = vld [vmem:[#allocation8 + $0x170] sm:$0xff]  }
 0x231   :  { %3810 = vmatprep.subr.bf16.mxu0 %v4942_v56  ;;  %3851 = vmatprep.subr.bf16.mxu1 %v5070_v57  ;;  %v5269_v55 = vld [vmem:[#allocation8 + $0xa8] sm:$0xff]   ;;  %v5270_v56 = vld [vmem:[#allocation8 + $0x60] sm:$0xff]   ;;  %v5308_v47 = vld [vmem:[#allocation8 + $0x1f0] sm:$0xff]  }
 0x232   :  { %v5293_v14 = vld [vmem:[#allocation8 + $0x130] sm:$0xff]  }
 0x234   :  { %3811 = vmatpush2.bf16.msra.mxu0 %v4941_v1  ;;  %3852 = vmatpush2.bf16.msra.mxu1 %v5069_v2  ;;  %v5275_v1 = vld [vmem:[#allocation8 + $0xd8] sm:$0xff]  }
 0x235   :  { %3812 = vmatprep.subr.bf16.mxu0 %v4934_v3  ;;  %3853 = vmatprep.subr.bf16.mxu1 %v5062_v4  ;;  %v5276_v2 = vld [vmem:[#allocation8 + $0x18] sm:$0xff]   ;;  %v5278_v4 = vld [vmem:[#allocation8 + $0x50] sm:$0xff]  }
 0x236   :  { %v5277_v3 = vld [vmem:[#allocation8 + $0x98] sm:$0xff]  }
 0x238   :  { %3813 = vmatpush2.bf16.msra.mxu0 %v4933_v11  ;;  %3854 = vmatpush2.bf16.msra.mxu1 %v5061_v12  ;;  %v5283_v11 = vld [vmem:[#allocation8 + $0xc8] sm:$0xff]  }
 0x239   :  { %3814 = vmatprep.subr.bf16.mxu0 %v4926_v13  ;;  %3855 = vmatprep.subr.bf16.mxu1 %v5054_v15  ;;  %v5284_v12 = vld [vmem:[#allocation8 + $0x8] sm:$0xff]   ;;  %v5286_v15 = vld [vmem:[#allocation8 + $0x40] sm:$0xff]  }
 0x23a   :  { %v5285_v13 = vld [vmem:[#allocation8 + $0x88] sm:$0xff]  }
 0x23c   :  { %3815 = vmatpush2.bf16.msra.mxu0 %v4925_v21  ;;  %3856 = vmatpush2.bf16.msra.mxu1 %v5053_v36  ;;  %v5290_v21 = vld [vmem:[#allocation8 + $0x178] sm:$0xff]   ;;  %v3872_v36 = vmax.f32 %v5579_v35, 0.0  ;;  %v5309_v35 = vld [vmem:[#allocation8 + $0x1b0] sm:$0xff]  }
 0x23d   :  { %3816 = vmatprep.subr.bf16.mxu0 %v4918_v59  ;;  %3857 = vmatprep.subr.bf16.mxu1 %v5046_v22  ;;  %v5306_v59 = vld [vmem:[#allocation8 + $0x1f8] sm:$0xff]  }
 0x23e   :  { %v5291_v22 = vld [vmem:[#allocation8 + $0x138] sm:$0xff]   ;;  %v3880_v27 = vpack.c.bf16 %v3872_v36, %v3872_v36 }
 0x240   :  { %3817 = vmatpush2.bf16.msra.mxu0 %v4917_v29  ;;  %3858 = vmatpush2.bf16.msra.mxu1 %v5045_v30  ;;  %v5294_v29 = vld [vmem:[#allocation8 + $0x168] sm:$0xff]  }
 0x241   :  { %3818 = vmatprep.subr.bf16.mxu0 %v4910_v33  ;;  %3859 = vmatprep.subr.bf16.mxu1 %v5038_v34  ;;  %v5310_v30 = vld [vmem:[#allocation8 + $0x1e8] sm:$0xff]   ;;  %v5296_v34 = vld [vmem:[#allocation8 + $0x160] sm:$0xff]  }
 0x242   :  { %v5295_v33 = vld [vmem:[#allocation8 + $0x128] sm:$0xff]  }
 0x244   :  { %3819 = vmatpush2.bf16.msra.mxu0 %v4909_v40  ;;  %3860 = vmatpush2.bf16.msra.mxu1 %v5037_v41  ;;  %v5312_v40 = vld [vmem:[#allocation8 + $0x1e0] sm:$0xff]  }
 0x245   :  { %5160 = vmatprep.subr.bf16.mxu0 %v5258_v7  ;;  %5182 = vmatprep.subr.bf16.mxu1 %v5259_v20  ;;  %v5297_v41 = vld [vmem:[#allocation8 + $0x120] sm:$0xff]   ;;  %v5298_v7 = vld [vmem:[#allocation8 + $0x158] sm:$0xff]  }
 0x246   :  { %v5313_v20 = vld [vmem:[#allocation8 + $0x1a0] sm:$0xff]  }
 0x247   :  { %v5589_v37 = vpop.f32.mrf.mxu0  ;;  %3821 = vmatmul.mubr.bf16.vlgmr.msra.gmra.mxu0 %v5524_v38  ;;  %v5592_v49 = vpop.f32.mrf.mxu1  ;;  %3862 = vmatmul.mubr.bf16.vlgmr.msra.gmra.mxu1 %v5526_v39 }
 0x248   :  { %5161 = vmatpush3.bf16.msra.mxu0 %v5260_v42  ;;  %4437 = vmatprep.mubr.bf16.mxu0 %v3879_v45  ;;  %v5300_v42 = vld [vmem:[#allocation8 + $0x150] sm:$0xff]   ;;  %v5302_v45 = vld [vmem:[#allocation8 + $0x148] sm:$0xff]  }
 0x249   :  { %5183 = vmatpush3.bf16.msra.mxu1 %v5261_v43  ;;  %v5595_v50 = vpop.f32.mrf.mxu0  ;;  %4477 = vmatprep.mubr.bf16.mxu1 %v3881_v48  ;;  %v5597_v53 = vpop.f32.mrf.mxu1  ;;  %v5315_v43 = vld [vmem:[#allocation8 + $0x198] sm:$0xff]   ;;  %v636_v48 = vsub.s32 5, %v5536_v60 }
 0x24a   :  { %5162 = vmatprep.subr.bf16.mxu0 %v5262_v44  ;;  %5184 = vmatprep.subr.bf16.mxu1 %v5263_v46  ;;  %v5301_v44 = vld [vmem:[#allocation8 + $0x110] sm:$0xff]   ;;  %v632_v46 = vsub.s32 4, %v5536_v60 }
 0x24b   :  { %v3580_v38 = vpop.f32.mrf.mxu0  ;;  %v3621_v54 = vpop.f32.mrf.mxu1 }
 0x24c   :  { %5163 = vmatpush3.bf16.msra.mxu0 %v5264_v24  ;;  %v5303_v24 = vld [vmem:[#allocation8 + $0x108] sm:$0xff]   ;;  %v5305_v54 = vld [vmem:[#allocation8 + $0x100] sm:$0xff]  }
 0x24d   :  { %5185 = vmatpush3.bf16.msra.mxu1 %v5265_v51  ;;  %v3581_v39 = vpop.f32.mrf.mxu0  ;;  %5164 = vmatprep.subr.bf16.mxu0 %v5266_v52  ;;  %v3622_v57 = vpop.f32.mrf.mxu1  ;;  %v5304_v51 = vld [vmem:[#allocation8 + $0x140] sm:$0xff]   ;;  %v5322_v52 = vld [vmem:[#allocation7] sm:$0xff] }
 0x24e   :  { %5186 = vmatprep.subr.bf16.mxu1 %v5267_v28  ;;  %v633_v28 = vrot.slane %v5322_v52, %v632_v46  ;;  %v637_v38 = vrot.slane %v5322_v52, %v636_v48  ;;  %v5316_v57 = vld [vmem:[#allocation8 + $0x1d0] sm:$0xff]  }
 0x250   :  { %5165 = vmatpush3.bf16.msra.mxu0 %v5268_v31  ;;  %v3577_v31 = vadd.f32 %v5589_v37, %v633_v28  ;;  %v3579_v39 = vadd.f32 %v5595_v50, %v637_v38  ;;  %v5318_v37 = vld [vmem:[#allocation8 + $0x1c8] sm:$0xff]  }
 0x251   :  { %5187 = vmatpush3.bf16.msra.mxu1 %v5269_v55  ;;  %5166 = vmatprep.subr.bf16.mxu0 %v5270_v56 }
 0x252   :  { %5188 = vmatprep.subr.bf16.mxu1 %v5271_v61  ;;  %v3618_v55 = vadd.f32 %v5592_v49, %v3577_v31  ;;  %v3620_v61 = vadd.f32 %v5597_v53, %v3579_v39  ;;  %v5320_v53 = vld [vmem:[#allocation8 + $0x1c0] sm:$0xff]  }
 0x254   :  { %5167 = vmatpush3.bf16.msra.mxu0 %v5272_v62 }
 0x255   :  { %5189 = vmatpush3.bf16.msra.mxu1 %v5273_v63  ;;  %5168 = vmatprep.subr.bf16.mxu0 %v5274_v0  ;;  %v5317_v0 = vld [vmem:[#allocation8 + $0x190] sm:$0xff]  }
 0x256   :  { %5190 = vmatprep.subr.bf16.mxu1 %v5275_v1 }
 0x258   :  { %5169 = vmatpush3.bf16.msra.mxu0 %v5276_v2 }
 0x259   :  { %5191 = vmatpush3.bf16.msra.mxu1 %v5277_v3  ;;  %5170 = vmatprep.subr.bf16.mxu0 %v5278_v4 }
 0x25a   :  { %5192 = vmatprep.subr.bf16.mxu1 %v5279_v5 }
 0x25c   :  { %5171 = vmatpush3.bf16.msra.mxu0 %v5280_v6 }
 0x25d   :  { %5193 = vmatpush3.bf16.msra.mxu1 %v5281_v9  ;;  %5172 = vmatprep.subr.bf16.mxu0 %v5282_v10  ;;  %v5319_v9 = vld [vmem:[#allocation8 + $0x188] sm:$0xff]  }
 0x25e   :  { %5194 = vmatprep.subr.bf16.mxu1 %v5283_v11 }
 0x260   :  { %5173 = vmatpush3.bf16.msra.mxu0 %v5284_v12 }
 0x261   :  { %5195 = vmatpush3.bf16.msra.mxu1 %v5285_v13  ;;  %5174 = vmatprep.subr.bf16.mxu0 %v5286_v15  ;;  %v5321_v15 = vld [vmem:[#allocation8 + $0x180] sm:$0xff]  }
 0x262   :  { %5196 = vmatprep.subr.bf16.mxu1 %v5287_v17 }
 0x264   :  { %5175 = vmatpush3.bf16.msra.mxu0 %v5288_v18 }
 0x265   :  { %5197 = vmatpush3.bf16.msra.mxu1 %v5289_v19  ;;  %5204 = vmatprep.subr.bf16.mxu0 %v5290_v21 }
 0x266   :  { %5226 = vmatprep.subr.bf16.mxu1 %v5306_v59 }
 0x267   :  { %4438 = vmatmul.mubr.bf16.vlgmr.msra.gmra.mxu0 %v3878_v23 }
 0x268   :  { %4478 = vmatmul.mubr.bf16.vlgmr.msra.gmra.mxu1 %v3880_v27  ;;  %5205 = vmatpush3.bf16.msra.mxu0 %v5291_v22 }
 0x269   :  { %5206 = vmatprep.subr.bf16.mxu0 %v5292_v25  ;;  %5227 = vmatpush3.bf16.msra.mxu1 %v5307_v26  ;;  %v640_v25 = vsub.s32 6, %v5536_v60  ;;  %v644_v26 = vsub.s32 7, %v5536_v60 }
 0x26a   :  { %5228 = vmatprep.subr.bf16.mxu1 %v5308_v47 }
 0x26b   :  { %v641_v27 = vrot.slane %v5322_v52, %v640_v25  ;;  %v645_v47 = vrot.slane %v5322_v52, %v644_v26  ;;  %v5095_v52 = vld [vmem:[#allocation10] ss:$0 sm:$0xff] }
 0x26c   :  { %5207 = vmatpush3.bf16.msra.mxu0 %v5293_v14 }
 0x26d   :  { %5208 = vmatprep.subr.bf16.mxu0 %v5294_v29  ;;  %5229 = vmatpush3.bf16.msra.mxu1 %v5309_v35 }
 0x26e   :  { %5230 = vmatprep.subr.bf16.mxu1 %v5310_v30 }
 0x270   :  { %5209 = vmatpush3.bf16.msra.mxu0 %v5295_v33 }
 0x271   :  { %5210 = vmatprep.subr.bf16.mxu0 %v5296_v34  ;;  %5231 = vmatpush3.bf16.msra.mxu1 %v5311_v16 }
 0x272   :  { %5232 = vmatprep.subr.bf16.mxu1 %v5312_v40 }
 0x274   :  { %5211 = vmatpush3.bf16.msra.mxu0 %v5297_v41 }
 0x275   :  { %5212 = vmatprep.subr.bf16.mxu0 %v5298_v7  ;;  %5233 = vmatpush3.bf16.msra.mxu1 %v5313_v20 }
 0x276   :  { %5234 = vmatprep.subr.bf16.mxu1 %v5314_v8 }
 0x278   :  { %5213 = vmatpush3.bf16.msra.mxu0 %v5299_v32 }
 0x279   :  { %5214 = vmatprep.subr.bf16.mxu0 %v5300_v42  ;;  %5235 = vmatpush3.bf16.msra.mxu1 %v5315_v43 }
 0x27a   :  { %5236 = vmatprep.subr.bf16.mxu1 %v5316_v57 }
 0x27c   :  { %5215 = vmatpush3.bf16.msra.mxu0 %v5301_v44 }
 0x27d   :  { %5216 = vmatprep.subr.bf16.mxu0 %v5302_v45  ;;  %5237 = vmatpush3.bf16.msra.mxu1 %v5317_v0 }
 0x27e   :  { %5238 = vmatprep.subr.bf16.mxu1 %v5318_v37 }
 0x280   :  { %5217 = vmatpush3.bf16.msra.mxu0 %v5303_v24 }
 0x281   :  { %5218 = vmatprep.subr.bf16.mxu0 %v5304_v51  ;;  %5239 = vmatpush3.bf16.msra.mxu1 %v5319_v9 }
 0x282   :  { %5240 = vmatprep.subr.bf16.mxu1 %v5320_v53 }
 0x284   :  { %5219 = vmatpush3.bf16.msra.mxu0 %v5305_v54 }
 0x285   :  { %5241 = vmatpush3.bf16.msra.mxu1 %v5321_v15 }
 0x287   :  { %v3658_v56 = vpop.f32.mrf.mxu0  ;;  %v3699_v63 = vpop.f32.mrf.mxu1 }
 0x288   :  { %v3659_v62 = vadd.f32 %v3658_v56, %v3618_v55 }
 0x289   :  { %v3660_v1 = vpop.f32.mrf.mxu0  ;;  %v3701_v4 = vpop.f32.mrf.mxu1 }
 0x28a   :  { %v3700_v2 = vadd.f32 %v3699_v63, %v3659_v62  ;;  %v3661_v3 = vadd.f32 %v3660_v1, %v3620_v61 }
 0x28b   :  { %v3662_v5 = vpop.f32.mrf.mxu0  ;;  %v3703_v50 = vpop.f32.mrf.mxu1 }
 0x28c   :  { %v3702_v6 = vadd.f32 %v3701_v4, %v3661_v3  ;;  %v3874_v10 = vmax.f32 %v3700_v2, 0.0 }
 0x28d   :  { %v3663_v49 = vpop.f32.mrf.mxu0  ;;  %v3704_v12 = vpop.f32.mrf.mxu1 }
 0x28e   :  { %v3875_v11 = vmax.f32 %v3702_v6, 0.0  ;;  %v3882_v17 = vpack.c.bf16 %v3874_v10, %v3874_v10 }
 0x290   :  { %v3883_v13 = vpack.c.bf16 %v3875_v11, %v3875_v11 }
 0x292   :  { %4517 = vmatprep.mubr.bf16.mxu0 %v3883_v13 }
 0x293   :  { %4518 = vmatmul.mubr.bf16.vlgmr.msra.gmra.mxu0 %v3882_v17 }
 0x2c7   :  { %v3740_v18 = vpop.f32.mrf.mxu0  ;;  %v3781_v58 = vpop.f32.mrf.mxu1 }
 0x2c8   :  { %v3741_v14 = vadd.f32 %v3740_v18, %v641_v27 }
 0x2c9   :  { %v3742_v19 = vpop.f32.mrf.mxu0  ;;  %v3783_v21 = vpop.f32.mrf.mxu1 }
 0x2ca   :  { %v3743_v29 = vadd.f32 %v3742_v19, %v645_v47  ;;  %v3782_v35 = vadd.f32 %v3781_v58, %v3741_v14 }
 0x2cb   :  { %v3744_v36 = vpop.f32.mrf.mxu0  ;;  %v3785_v59 = vpop.f32.mrf.mxu1 }
 0x2cc   :  { %v3784_v33 = vadd.f32 %v3783_v21, %v3743_v29 }
 0x2cd   :  { %v3745_v22 = vpop.f32.mrf.mxu0  ;;  %v3786_v23 = vpop.f32.mrf.mxu1 }
 0x307   :  { %v3822_v30 = vpop.f32.mrf.mxu0  ;;  %v3863_v16 = vpop.f32.mrf.mxu1 }
 0x308   :  { %v3823_v34 = vadd.f32 %v3822_v30, %v3782_v35 }
 0x309   :  { %v3824_v40 = vpop.f32.mrf.mxu0  ;;  %v3865_v20 = vpop.f32.mrf.mxu1 }
 0x30a   :  { %v3864_v41 = vadd.f32 %v3863_v16, %v3823_v34  ;;  %v3825_v7 = vadd.f32 %v3824_v40, %v3784_v33 }
 0x30b   :  { %v3826_v8 = vpop.f32.mrf.mxu0  ;;  %v3867_v42 = vpop.f32.mrf.mxu1 }
 0x30c   :  { %v3866_v32 = vadd.f32 %v3865_v20, %v3825_v7  ;;  %v3876_v43 = vmax.f32 %v3864_v41, 0.0 }
 0x30d   :  { %v3827_v44 = vpop.f32.mrf.mxu0  ;;  %v3868_v60 = vpop.f32.mrf.mxu1 }
 0x30e   :  { %v3877_v45 = vmax.f32 %v3866_v32, 0.0  ;;  %v3884_v48 = vpack.c.bf16 %v3876_v43, %v3876_v43 }
 0x310   :  { %v3885_v46 = vpack.c.bf16 %v3877_v45, %v3877_v45 }
 0x312   :  { %4557 = vmatprep.mubr.bf16.mxu1 %v3885_v46 }
 0x313   :  { %4558 = vmatmul.mubr.bf16.vlgmr.msra.gmra.mxu1 %v3884_v48 }
 0x327   :  { %v5176_v24 = vpop.f32.mrf.mxu0 }
 0x328   :  { %v5198_v51 = vpop.f32.mrf.mxu1 }
 0x329   :  { %v5177_v28 = vpop.f32.mrf.mxu0 }
 0x32a   :  { %v5178_v38 = vadd.f32 %v5177_v28, %v5176_v24  ;;  %v5199_v54 = vpop.f32.mrf.mxu1 }
 0x32b   :  { %v5200_v31 = vadd.f32 %v5199_v54, %v5198_v51  ;;  %v5179_v39 = vpop.f32.mrf.mxu0 }
 0x32c   :  { %v4440_v55 = vadd.f32 %v5178_v38, %v5095_v52  ;;  %v5201_v56 = vpop.f32.mrf.mxu1 }
 0x32d   :  { %v5180_v57 = vpop.f32.mrf.mxu0 }
 0x32e   :  { %v4480_v61 = vadd.f32 %v5200_v31, %v4440_v55  ;;  %v5202_v62 = vpop.f32.mrf.mxu1 }
 0x353   :  { %v5220_v63 = vpop.f32.mrf.mxu0 }
 0x355   :  { %v5221_v0 = vpop.f32.mrf.mxu0 }
 0x356   :  { %v5222_v1 = vadd.f32 %v5221_v0, %v5220_v63 }
 0x357   :  { %v5223_v2 = vpop.f32.mrf.mxu0 }
 0x358   :  { %v4520_v3 = vadd.f32 %v5222_v1, %v4480_v61 }
 0x359   :  { %v5224_v4 = vpop.f32.mrf.mxu0 }
 0x3d3   :  { %v5242_v5 = vpop.f32.mrf.mxu1 }
 0x3d5   :  { %v5243_v37 = vpop.f32.mrf.mxu1 }
 0x3d6   :  { %v5244_v6 = vadd.f32 %v5243_v37, %v5242_v5 }
 0x3d7   :  { %v5245_v50 = vpop.f32.mrf.mxu1 }
 0x3d8   :  { %v4560_v9 = vadd.f32 %v5244_v6, %v4520_v3 }
 0x3d9   :  { %v5246_v10 = vpop.f32.mrf.mxu1 }
 0x3da   :  { %4565 = vst [vmem:[#allocation11] sm:$0xff] %v4560_v9 }
 0x3db   :  { %5434 = shalt.err (!%p5431_p1)
}
 0x3dc   :  { %4575 = dma.vmem_to_hbm [thread:$0]  %s4573_s4, 128, %s5617_s5, [#allocation4]  }
 0x3dd   :  { %5449 = dma.done.wait [#allocation4], 128  }
 0x3de   :  { %5450 = vsyncadd [#allocation4], 4294967168 }
 0x3df   :  { %4579 = vsyncpa [#allocation3], 1 }
 0x3e0   :  { %4580 = vsyncpa [#allocation6], 1 }
 0x3e1   :  { %4581 = vsyncpa [#allocation9], 1 }
 0x3e2   :  { %4582 = vsyncpa [#allocation4], 1 }

</bundles_post_ra>
